<compile_context>
chip_gen: v7x
topology: tpu7x:2x2x1
jax: 0.10.0
libtpu: 0.0.40
codegen_flags: <defaults>
</compile_context>

<pallas_src>
import functools

import numpy as np

import jax
import jax.numpy as jnp
from jax.experimental import pallas as pl
from jax.experimental.pallas import tpu as pltpu

BN_EPS = 1e-5
LANE = 128                      # output channels padded to a multiple of this
SUBLANE = 16                    # row alignment safe for both f32 and bf16
VMEM_BUDGET = 8 * 1024 * 1024   # per-grid-step budget for pipelined blocks
VMEM_LIMIT = 32 * 1024 * 1024   # scoped VMEM limit (safe on v5e/v6e/v7x)


def _round_up(x, m):
    return (x + m - 1) // m * m


# ---------------------------------------------------------------------------
# Fused kernel: conv1 + bn1 + relu  ->  VMEM  ->  conv2 + bn2 + add + relu
# ---------------------------------------------------------------------------
def _basic_block_kernel(x_ref, w1_ref, b1_ref, mask_ref, w2_ref, b2_ref,
                        res_ref, o_ref, mid_ref, *, taps1, taps2, sh_a):
    """One batch-tile of the whole BasicBlock.

    x_ref:    (s*s, BX, Cin)    conv1 shifted-phase activations (+ tap halo)
    w1_ref:   (9, Cin, Cmid)    per-tap conv1 weights (BN1 scale folded in)
    b1_ref:   (1, Cmid)         folded BN1 bias (f32)
    mask_ref: (BR, 1)           1.0 on valid conv1-output rows, else 0.0
    w2_ref:   (9, Cmid, Cout)   per-tap conv2 weights (BN2 scale folded in)
    b2_ref:   (1, Cout)         folded BN2 bias (f32)
    res_ref:  (BR, Cout)        shortcut, laid out on conv2's output grid
    o_ref:    (BR, Cout)        block output
    mid_ref:  (BM, Cmid)        VMEM scratch = conv2's zero-padded input grid
    """
    br = o_ref.shape[0]

    # ---- conv1: 9 tap matmuls, f32 accumulation, + bias + ReLU + mask ----
    acc = None
    for t, (q, off) in enumerate(taps1):
        d = jnp.dot(x_ref[q, off:off + br, :], w1_ref[t],
                    preferred_element_type=jnp.float32)
        acc = d if acc is None else acc + d
    h = jnp.maximum(acc + b1_ref[...], 0.0) * mask_ref[...]

    # ---- lay the intermediate out as conv2's zero-padded input grid -------
    # scratch row (sh_a + r) holds masked conv1-output row r; the first sh_a
    # rows (and anything the masked rows don't cover) stay zero = the padding
    # ring of conv2's input.
    mid_ref[...] = jnp.zeros(mid_ref.shape, mid_ref.dtype)
    mid_ref[sh_a:sh_a + br, :] = h.astype(mid_ref.dtype)

    # ---- conv2: 9 tap matmuls on the VMEM intermediate + bias + add + ReLU
    acc2 = None
    for t, off in enumerate(taps2):
        d = jnp.dot(mid_ref[off:off + br, :], w2_ref[t],
                    preferred_element_type=jnp.float32)
        acc2 = d if acc2 is None else acc2 + d
    acc2 = acc2 + b2_ref[...] + res_ref[...].astype(jnp.float32)
    o_ref[...] = jnp.maximum(acc2, 0.0).astype(o_ref.dtype)


# ---------------------------------------------------------------------------
# pallas_call wrapper
# ---------------------------------------------------------------------------
def _pick_batch_tile(n, bytes_per_image, budget):
    """Largest divisor of `n` fitting `budget`, preferring >= 2 grid steps."""
    divisors = [d for d in range(1, n + 1) if n % d == 0]
    fitting = [d for d in divisors if d * bytes_per_image <= budget] or [1]
    multi_step = [d for d in fitting if n // d >= 2]
    return max(multi_step) if multi_step else max(fitting)


def _fused_basic_block(phases, w1, b1, w2, b2, res, *, ho, wo, stride,
                       out_dtype, compute_dtype):
    """Fused BasicBlock forward on flattened (ho+2, wo+2) per-image grids.

    phases: (s*s, N, rimg, Cin)  conv1 shifted-phase activations
    res:    (N, rimg, Cout) f32  shortcut on conv2's output grid
    rimg = (ho+2)*(wo+2).  Returns (N, rimg, Cout); rows outside the valid
    (ho, wo) window contain garbage and must be sliced off by the caller."""
    s2, n, rimg, cin = phases.shape
    cmid = w1.shape[-1]
    coutp = w2.shape[-1]
    s = stride
    W = wo + 2
    assert rimg == (ho + 2) * W

    # Static tap tables.
    taps1 = tuple(((kh % s) * s + (kw % s), (kh // s) * W + (kw // s))
                  for kh in range(3) for kw in range(3))
    maxoff1 = max(off for _, off in taps1)
    sh = W + 1                           # conv1-output -> conv2-input shift
    sh_a = _round_up(sh, SUBLANE)        # aligned placement in the scratch
    delta = sh_a - sh
    taps2 = tuple(kh * W + kw + delta for kh in range(3) for kw in range(3))
    maxoff2 = max(taps2)

    # ---- batch-tile selection from an explicit per-step VMEM budget ----
    x_bytes = s2 * rimg * cin * phases.dtype.itemsize
    r_bytes = rimg * coutp * 4
    o_bytes = rimg * coutp * jnp.dtype(out_dtype).itemsize
    mid_bytes = rimg * cmid * jnp.dtype(compute_dtype).itemsize
    tmp_bytes = 3 * rimg * max(cmid, coutp) * 4      # in-kernel f32 temps
    per_image = 2 * (x_bytes + r_bytes + o_bytes) + mid_bytes + tmp_bytes
    nb = _pick_batch_tile(n, per_image, VMEM_BUDGET)
    nblocks = n // nb

    rows = nb * rimg                     # meaningful rows per grid step
    br = _round_up(rows, SUBLANE)        # output / residual block rows
    bx = _round_up(br + maxoff1, SUBLANE)     # conv1 input rows (tap halo)
    bmid = _round_up(br + maxoff2, SUBLANE)   # VMEM intermediate rows

    # ---- blocked (grid-step contiguous) operand layouts ----
    xb = phases.reshape(s2, nblocks, rows, cin)
    xb = jnp.pad(xb, ((0, 0), (0, 0), (0, bx - rows), (0, 0)))
    xb = xb.reshape(s2, nblocks * bx, cin)

    rb = res.reshape(nblocks, rows, coutp)
    rb = jnp.pad(rb, ((0, 0), (0, br - rows), (0, 0)))
    rb = rb.reshape(nblocks * br, coutp)

    # Valid-window mask for the conv1-output rows of one grid step (same for
    # every step: each block holds `nb` whole images).
    r = np.arange(rimg)
    m_img = ((r // W < ho) & (r % W < wo)).astype(np.float32)
    mask = np.pad(np.tile(m_img, nb), (0, br - rows)).reshape(br, 1)
    mask = jnp.asarray(mask)

    kernel = functools.partial(_basic_block_kernel, taps1=taps1, taps2=taps2,
                               sh_a=sh_a)
    out = pl.pallas_call(
        kernel,
        out_shape=jax.ShapeDtypeStruct((nblocks * br, coutp), out_dtype),
        grid=(nblocks,),
        in_specs=[
            pl.BlockSpec((s2, bx, cin), lambda i: (0, i, 0)),
            pl.BlockSpec(w1.shape, lambda i: (0, 0, 0)),
            pl.BlockSpec(b1.shape, lambda i: (0, 0)),
            pl.BlockSpec(mask.shape, lambda i: (0, 0)),
            pl.BlockSpec(w2.shape, lambda i: (0, 0, 0)),
            pl.BlockSpec(b2.shape, lambda i: (0, 0)),
            pl.BlockSpec((br, coutp), lambda i: (i, 0)),
        ],
        out_specs=pl.BlockSpec((br, coutp), lambda i: (i, 0)),
        scratch_shapes=[pltpu.VMEM((bmid, cmid), compute_dtype)],
        compiler_params=pltpu.CompilerParams(
            dimension_semantics=("parallel",),
            vmem_limit_bytes=VMEM_LIMIT),
    )(xb, w1, b1, mask, w2, b2, rb)

    out = out.reshape(nblocks, br, coutp)[:, :rows, :]
    return out.reshape(n, rimg, coutp)


# ---------------------------------------------------------------------------
# Host-side glue: phase decomposition, weight/BN packing, shortcut
# ---------------------------------------------------------------------------
def _shifted_phases(x_nhwc, stride, cin_pad):
    """Zero-pad so every stride-phase is exactly (ho+2, wo+2), pad channels to
    `cin_pad`, decompose into stride**2 shifted phases and flatten per image.
    Returns (s*s, N, (ho+2)*(wo+2), cin_pad), ho, wo."""
    n, h, w, c = x_nhwc.shape
    s = stride
    ho = (h - 1) // s + 1
    wo = (w - 1) // s + 1
    extra_h = s * (ho + 2) - (h + 2)          # >= 0
    extra_w = s * (wo + 2) - (w + 2)          # >= 0
    xp = jnp.pad(x_nhwc, ((0, 0), (1, 1 + extra_h), (1, 1 + extra_w),
                          (0, cin_pad - c)))
    phases = []
    for ih in range(s):
        for iw in range(s):
            p = xp[:, ih::s, iw::s, :]                # (n, ho+2, wo+2, cin)
            phases.append(p.reshape(n, (ho + 2) * (wo + 2), cin_pad))
    return jnp.stack(phases, axis=0), ho, wo


def _pack_weights(w_oihw, gamma, beta, mean, var, cin_pad, cout_pad, dtype):
    """torch (O, I, 3, 3) conv weight + BN params -> (9, cin_pad, cout_pad)
    per-tap weights with the BN scale folded in, plus a (1, cout_pad) f32
    bias.  Padded channels get zero weight / zero bias."""
    o, i, _, _ = w_oihw.shape
    scale = gamma / jnp.sqrt(var + BN_EPS)                      # (O,)
    bias = beta - mean * scale                                  # (O,)
    w = jnp.transpose(w_oihw, (2, 3, 1, 0)).reshape(9, i, o)    # (kh*kw, I, O)
    w = w * scale[None, None, :]                                # fold BN scale
    w = jnp.pad(w, ((0, 0), (0, cin_pad - i), (0, cout_pad - o)))
    b = jnp.pad(bias, (0, cout_pad - o)).reshape(1, cout_pad)
    return w.astype(dtype), b.astype(jnp.float32)


@functools.partial(jax.jit, static_argnames=('in_planes', 'planes', 'stride',
                                              'option', 'compute_dtype'))
def basic_block_forward(x_nchw, p, *, in_planes, planes, stride, option='A',
                        compute_dtype=jnp.bfloat16):
    if option != 'A':
        # TODO(synk): option 'B' (1x1 conv + BN) shortcut not implemented.
        raise NotImplementedError("option 'B' shortcut is not implemented")

    x = jnp.transpose(x_nchw, (0, 2, 3, 1)).astype(jnp.float32)  # NCHW -> NHWC
    n, h, w, cin = x.shape
    assert cin == in_planes

    cin1 = _round_up(in_planes, 8)        # sublane-align the contraction dim
    cmid = _round_up(planes, LANE)        # lane-dense intermediate channels
    coutp = cmid                          # lane-dense output channels

    # conv1 input: stride-phase decomposition on the (ho+2, wo+2) grid
    phases, ho, wo = _shifted_phases(x.astype(compute_dtype), stride, cin1)

    w1, b1 = _pack_weights(p['conv1_w'], p['bn1_gamma'], p['bn1_beta'],
                           p['bn1_mean'], p['bn1_var'], cin1, cmid,
                           compute_dtype)
    w2, b2 = _pack_weights(p['conv2_w'], p['bn2_gamma'], p['bn2_beta'],
                           p['bn2_mean'], p['bn2_var'], cmid, coutp,
                           compute_dtype)

    # ---- option-'A' shortcut, laid out on conv2's flattened output grid ----
    if stride != 1 or in_planes != planes:
        pad = planes // 4
        sc = x[:, ::2, ::2, :]
        sc = jnp.pad(sc, ((0, 0), (0, 0), (0, 0),
                          (pad, coutp - in_planes - pad)))
    else:
        sc = jnp.pad(x, ((0, 0), (0, 0), (0, 0), (0, coutp - planes)))
    res = jnp.pad(sc, ((0, 0), (0, 2), (0, 2), (0, 0)))   # (N, ho+2, wo+2, Cp)
    res = res.reshape(n, (ho + 2) * (wo + 2), coutp).astype(jnp.float32)

    out = _fused_basic_block(phases, w1, b1, w2, b2, res,
                             ho=ho, wo=wo, stride=stride,
                             out_dtype=jnp.float32,
                             compute_dtype=compute_dtype)
    out = out.reshape(n, ho + 2, wo + 2, coutp)[:, :ho, :wo, :planes]
    return jnp.transpose(out, (0, 3, 1, 2))                      # NHWC -> NCHW


# ---------------------------------------------------------------------------
# Pure-JAX reference (lax.conv, HIGHEST precision) for correctness checking
# ---------------------------------------------------------------------------
def reference_forward(x, p, *, in_planes, planes, stride):
    prec = jax.lax.Precision.HIGHEST

    def conv(h, w, s):
        return jax.lax.conv_general_dilated(
            h, w, (s, s), ((1, 1), (1, 1)),
            dimension_numbers=('NCHW', 'OIHW', 'NCHW'), precision=prec)

    def bn(h, g, b, m, v):
        g, b, m, v = (t[None, :, None, None] for t in (g, b, m, v))
        return (h - m) / jnp.sqrt(v + BN_EPS) * g + b

    out = jax.nn.relu(bn(conv(x, p['conv1_w'], stride),
                         p['bn1_gamma'], p['bn1_beta'],
                         p['bn1_mean'], p['bn1_var']))
    out = bn(conv(out, p['conv2_w'], 1),
             p['bn2_gamma'], p['bn2_beta'], p['bn2_mean'], p['bn2_var'])
    if stride != 1 or in_planes != planes:
        pad = planes // 4
        sc = jnp.pad(x[:, :, ::2, ::2], ((0, 0), (pad, pad), (0, 0), (0, 0)))
    else:
        sc = x
    return jax.nn.relu(out + sc)


# ---------------------------------------------------------------------------
# Deterministic parameter init (shapes from BasicBlock.__init__)
# ---------------------------------------------------------------------------
def init_params(key, in_planes, planes):
    ks = jax.random.split(key, 10)
    return {
        'conv1_w': 0.1 * jax.random.normal(ks[0], (planes, in_planes, 3, 3), jnp.float32),
        'conv2_w': 0.1 * jax.random.normal(ks[1], (planes, planes, 3, 3), jnp.float32),
        'bn1_gamma': 1.0 + 0.1 * jax.random.normal(ks[2], (planes,), jnp.float32),
        'bn1_beta': 0.1 * jax.random.normal(ks[3], (planes,), jnp.float32),
        'bn1_mean': 0.1 * jax.random.normal(ks[4], (planes,), jnp.float32),
        'bn1_var': 0.5 + jnp.abs(jax.random.normal(ks[5], (planes,), jnp.float32)),
        'bn2_gamma': 1.0 + 0.1 * jax.random.normal(ks[6], (planes,), jnp.float32),
        'bn2_beta': 0.1 * jax.random.normal(ks[7], (planes,), jnp.float32),
        'bn2_mean': 0.1 * jax.random.normal(ks[8], (planes,), jnp.float32),
        'bn2_var': 0.5 + jnp.abs(jax.random.normal(ks[9], (planes,), jnp.float32)),
    }


if __name__ == "__main__":
    key = jax.random.PRNGKey(0)
    kx, kp1, kp2 = jax.random.split(key, 3)

    # Case 1: downsampling block (stride=2, in_planes != planes, option 'A').
    in_planes, planes, stride = 4, 8, 2
    x = jax.random.normal(kx, (2, in_planes, 16, 16), jnp.float32)   # NCHW
    params = init_params(kp1, in_planes, planes)
    ref = reference_forward(x, params, in_planes=in_planes, planes=planes,
                            stride=stride)

    out = basic_block_forward(x, params, in_planes=in_planes, planes=planes,
                              stride=stride, option='A',
                              compute_dtype=jnp.float32)
    out = jax.block_until_ready(out)
    assert out.shape == (2, planes, 8, 8)
    assert jnp.allclose(out, ref, rtol=1e-4, atol=1e-4), "stride-2 f32 mismatch"

    # Case 2: identity-shortcut block (stride=1, in_planes == planes).
    in_planes2 = planes2 = 8
    x2 = jax.random.normal(kx, (2, in_planes2, 16, 16), jnp.float32)
    params2 = init_params(kp2, in_planes2, planes2)
    ref2 = reference_forward(x2, params2, in_planes=in_planes2, planes=planes2,
                             stride=1)

    out2 = basic_block_forward(x2, params2, in_planes=in_planes2,
                               planes=planes2, stride=1, option='A',
                               compute_dtype=jnp.float32)
    out2 = jax.block_until_ready(out2)
    assert out2.shape == (2, planes2, 16, 16)
    assert jnp.allclose(out2, ref2, rtol=1e-4, atol=1e-4), "stride-1 f32 mismatch"

    # Case 3: default bf16-MXU path (f32 accumulation / epilogue).
    out_bf16 = basic_block_forward(x, params, in_planes=in_planes,
                                   planes=planes, stride=stride, option='A',
                                   compute_dtype=jnp.bfloat16)
    out_bf16 = jax.block_until_ready(out_bf16)
    rel = jnp.linalg.norm(out_bf16 - ref) / (jnp.linalg.norm(ref) + 1e-6)
    assert rel < 5e-2, f"bf16 relative error too large: {rel}"

    print("KERNEL_OK")
</pallas_src>

<mosaic_0001>
module attributes {stable_mosaic.version = 11 : i64} {
  func.func @_basic_block_kernel(%arg0: i32, %arg1: memref<4x128x8xf32, #tpu.memory_space<vmem>>, %arg2: memref<9x8x128xf32, #tpu.memory_space<vmem>>, %arg3: memref<1x128xf32, #tpu.memory_space<vmem>>, %arg4: memref<112x1xf32, #tpu.memory_space<vmem>>, %arg5: memref<9x128x128xf32, #tpu.memory_space<vmem>>, %arg6: memref<1x128xf32, #tpu.memory_space<vmem>>, %arg7: memref<112x128xf32, #tpu.memory_space<vmem>>, %arg8: memref<112x128xf32, #tpu.memory_space<vmem>>, %arg9: memref<144x128xf32, #tpu.memory_space<vmem>>) attributes {dimension_semantics = [#tpu.dimension_semantics<parallel>], iteration_bounds = array<i64: 2>, scalar_prefetch = 0 : i64, scratch_operands = 1 : i64, tpu.core_type = #tpu.core_type<tc>, window_params = [{transform_indices = @transform_0, window_bounds = array<i64: 4, 128, 8>}, {pipeline_mode = #tpu.pipeline_mode<synchronous>, transform_indices = @transform_1, window_bounds = array<i64: 9, 8, 128>}, {pipeline_mode = #tpu.pipeline_mode<synchronous>, transform_indices = @transform_2, window_bounds = array<i64: 1, 128>}, {pipeline_mode = #tpu.pipeline_mode<synchronous>, transform_indices = @transform_3, window_bounds = array<i64: 112, 1>}, {pipeline_mode = #tpu.pipeline_mode<synchronous>, transform_indices = @transform_4, window_bounds = array<i64: 9, 128, 128>}, {pipeline_mode = #tpu.pipeline_mode<synchronous>, transform_indices = @transform_5, window_bounds = array<i64: 1, 128>}, {transform_indices = @transform_6, window_bounds = array<i64: 112, 128>}, {transform_indices = @transform_7, window_bounds = array<i64: 112, 128>}]} {
    %c0 = arith.constant 0 : index
    %c0_0 = arith.constant 0 : index
    %c0_1 = arith.constant 0 : index
    %0 = vector.load %arg1[%c0, %c0_0, %c0_1] : memref<4x128x8xf32, #tpu.memory_space<vmem>>, vector<1x112x8xf32>
    %1 = vector.shape_cast %0 : vector<1x112x8xf32> to vector<112x8xf32>
    %c0_2 = arith.constant 0 : index
    %c0_3 = arith.constant 0 : index
    %c0_4 = arith.constant 0 : index
    %2 = vector.load %arg2[%c0_2, %c0_3, %c0_4] : memref<9x8x128xf32, #tpu.memory_space<vmem>>, vector<1x8x128xf32>
    %3 = vector.shape_cast %2 : vector<1x8x128xf32> to vector<8x128xf32>
    %cst = arith.constant dense<0.000000e+00> : vector<112x128xf32>
    %4 = tpu.matmul %1, %3, %cst {dimension_numbers = #tpu.dot_dimension_numbers<[1], [0], [0], [1], [0, 0, 1, 1], [], []>} : vector<112x8xf32>, vector<8x128xf32>, vector<112x128xf32> -> vector<112x128xf32>
    %c1 = arith.constant 1 : index
    %c0_5 = arith.constant 0 : index
    %c0_6 = arith.constant 0 : index
    %5 = vector.load %arg1[%c1, %c0_5, %c0_6] : memref<4x128x8xf32, #tpu.memory_space<vmem>>, vector<1x112x8xf32>
    %6 = vector.shape_cast %5 : vector<1x112x8xf32> to vector<112x8xf32>
    %c1_7 = arith.constant 1 : index
    %c0_8 = arith.constant 0 : index
    %c0_9 = arith.constant 0 : index
    %7 = vector.load %arg2[%c1_7, %c0_8, %c0_9] : memref<9x8x128xf32, #tpu.memory_space<vmem>>, vector<1x8x128xf32>
    %8 = vector.shape_cast %7 : vector<1x8x128xf32> to vector<8x128xf32>
    %cst_10 = arith.constant dense<0.000000e+00> : vector<112x128xf32>
    %9 = tpu.matmul %6, %8, %cst_10 {dimension_numbers = #tpu.dot_dimension_numbers<[1], [0], [0], [1], [0, 0, 1, 1], [], []>} : vector<112x8xf32>, vector<8x128xf32>, vector<112x128xf32> -> vector<112x128xf32>
    %10 = arith.addf %4, %9 : vector<112x128xf32>
    %c0_11 = arith.constant 0 : index
    %c1_12 = arith.constant 1 : index
    %c0_13 = arith.constant 0 : index
    %11 = vector.load %arg1[%c0_11, %c1_12, %c0_13] : memref<4x128x8xf32, #tpu.memory_space<vmem>>, vector<1x112x8xf32>
    %12 = vector.shape_cast %11 : vector<1x112x8xf32> to vector<112x8xf32>
    %c2 = arith.constant 2 : index
    %c0_14 = arith.constant 0 : index
    %c0_15 = arith.constant 0 : index
    %13 = vector.load %arg2[%c2, %c0_14, %c0_15] : memref<9x8x128xf32, #tpu.memory_space<vmem>>, vector<1x8x128xf32>
    %14 = vector.shape_cast %13 : vector<1x8x128xf32> to vector<8x128xf32>
    %cst_16 = arith.constant dense<0.000000e+00> : vector<112x128xf32>
    %15 = tpu.matmul %12, %14, %cst_16 {dimension_numbers = #tpu.dot_dimension_numbers<[1], [0], [0], [1], [0, 0, 1, 1], [], []>} : vector<112x8xf32>, vector<8x128xf32>, vector<112x128xf32> -> vector<112x128xf32>
    %16 = arith.addf %10, %15 : vector<112x128xf32>
    %c2_17 = arith.constant 2 : index
    %c0_18 = arith.constant 0 : index
    %c0_19 = arith.constant 0 : index
    %17 = vector.load %arg1[%c2_17, %c0_18, %c0_19] : memref<4x128x8xf32, #tpu.memory_space<vmem>>, vector<1x112x8xf32>
    %18 = vector.shape_cast %17 : vector<1x112x8xf32> to vector<112x8xf32>
    %c3 = arith.constant 3 : index
    %c0_20 = arith.constant 0 : index
    %c0_21 = arith.constant 0 : index
    %19 = vector.load %arg2[%c3, %c0_20, %c0_21] : memref<9x8x128xf32, #tpu.memory_space<vmem>>, vector<1x8x128xf32>
    %20 = vector.shape_cast %19 : vector<1x8x128xf32> to vector<8x128xf32>
    %cst_22 = arith.constant dense<0.000000e+00> : vector<112x128xf32>
    %21 = tpu.matmul %18, %20, %cst_22 {dimension_numbers = #tpu.dot_dimension_numbers<[1], [0], [0], [1], [0, 0, 1, 1], [], []>} : vector<112x8xf32>, vector<8x128xf32>, vector<112x128xf32> -> vector<112x128xf32>
    %22 = arith.addf %16, %21 : vector<112x128xf32>
    %c3_23 = arith.constant 3 : index
    %c0_24 = arith.constant 0 : index
    %c0_25 = arith.constant 0 : index
    %23 = vector.load %arg1[%c3_23, %c0_24, %c0_25] : memref<4x128x8xf32, #tpu.memory_space<vmem>>, vector<1x112x8xf32>
    %24 = vector.shape_cast %23 : vector<1x112x8xf32> to vector<112x8xf32>
    %c4 = arith.constant 4 : index
    %c0_26 = arith.constant 0 : index
    %c0_27 = arith.constant 0 : index
    %25 = vector.load %arg2[%c4, %c0_26, %c0_27] : memref<9x8x128xf32, #tpu.memory_space<vmem>>, vector<1x8x128xf32>
    %26 = vector.shape_cast %25 : vector<1x8x128xf32> to vector<8x128xf32>
    %cst_28 = arith.constant dense<0.000000e+00> : vector<112x128xf32>
    %27 = tpu.matmul %24, %26, %cst_28 {dimension_numbers = #tpu.dot_dimension_numbers<[1], [0], [0], [1], [0, 0, 1, 1], [], []>} : vector<112x8xf32>, vector<8x128xf32>, vector<112x128xf32> -> vector<112x128xf32>
    %28 = arith.addf %22, %27 : vector<112x128xf32>
    %c2_29 = arith.constant 2 : index
    %c1_30 = arith.constant 1 : index
    %c0_31 = arith.constant 0 : index
    %29 = vector.load %arg1[%c2_29, %c1_30, %c0_31] : memref<4x128x8xf32, #tpu.memory_space<vmem>>, vector<1x112x8xf32>
    %30 = vector.shape_cast %29 : vector<1x112x8xf32> to vector<112x8xf32>
    %c5 = arith.constant 5 : index
    %c0_32 = arith.constant 0 : index
    %c0_33 = arith.constant 0 : index
    %31 = vector.load %arg2[%c5, %c0_32, %c0_33] : memref<9x8x128xf32, #tpu.memory_space<vmem>>, vector<1x8x128xf32>
    %32 = vector.shape_cast %31 : vector<1x8x128xf32> to vector<8x128xf32>
    %cst_34 = arith.constant dense<0.000000e+00> : vector<112x128xf32>
    %33 = tpu.matmul %30, %32, %cst_34 {dimension_numbers = #tpu.dot_dimension_numbers<[1], [0], [0], [1], [0, 0, 1, 1], [], []>} : vector<112x8xf32>, vector<8x128xf32>, vector<112x128xf32> -> vector<112x128xf32>
    %34 = arith.addf %28, %33 : vector<112x128xf32>
    %c0_35 = arith.constant 0 : index
    %c10 = arith.constant 10 : index
    %c0_36 = arith.constant 0 : index
    %35 = vector.load %arg1[%c0_35, %c10, %c0_36] : memref<4x128x8xf32, #tpu.memory_space<vmem>>, vector<1x112x8xf32>
    %36 = vector.shape_cast %35 : vector<1x112x8xf32> to vector<112x8xf32>
    %c6 = arith.constant 6 : index
    %c0_37 = arith.constant 0 : index
    %c0_38 = arith.constant 0 : index
    %37 = vector.load %arg2[%c6, %c0_37, %c0_38] : memref<9x8x128xf32, #tpu.memory_space<vmem>>, vector<1x8x128xf32>
    %38 = vector.shape_cast %37 : vector<1x8x128xf32> to vector<8x128xf32>
    %cst_39 = arith.constant dense<0.000000e+00> : vector<112x128xf32>
    %39 = tpu.matmul %36, %38, %cst_39 {dimension_numbers = #tpu.dot_dimension_numbers<[1], [0], [0], [1], [0, 0, 1, 1], [], []>} : vector<112x8xf32>, vector<8x128xf32>, vector<112x128xf32> -> vector<112x128xf32>
    %40 = arith.addf %34, %39 : vector<112x128xf32>
    %c1_40 = arith.constant 1 : index
    %c10_41 = arith.constant 10 : index
    %c0_42 = arith.constant 0 : index
    %41 = vector.load %arg1[%c1_40, %c10_41, %c0_42] : memref<4x128x8xf32, #tpu.memory_space<vmem>>, vector<1x112x8xf32>
    %42 = vector.shape_cast %41 : vector<1x112x8xf32> to vector<112x8xf32>
    %c7 = arith.constant 7 : index
    %c0_43 = arith.constant 0 : index
    %c0_44 = arith.constant 0 : index
    %43 = vector.load %arg2[%c7, %c0_43, %c0_44] : memref<9x8x128xf32, #tpu.memory_space<vmem>>, vector<1x8x128xf32>
    %44 = vector.shape_cast %43 : vector<1x8x128xf32> to vector<8x128xf32>
    %cst_45 = arith.constant dense<0.000000e+00> : vector<112x128xf32>
    %45 = tpu.matmul %42, %44, %cst_45 {dimension_numbers = #tpu.dot_dimension_numbers<[1], [0], [0], [1], [0, 0, 1, 1], [], []>} : vector<112x8xf32>, vector<8x128xf32>, vector<112x128xf32> -> vector<112x128xf32>
    %46 = arith.addf %40, %45 : vector<112x128xf32>
    %c0_46 = arith.constant 0 : index
    %c11 = arith.constant 11 : index
    %c0_47 = arith.constant 0 : index
    %47 = vector.load %arg1[%c0_46, %c11, %c0_47] : memref<4x128x8xf32, #tpu.memory_space<vmem>>, vector<1x112x8xf32>
    %48 = vector.shape_cast %47 : vector<1x112x8xf32> to vector<112x8xf32>
    %c8 = arith.constant 8 : index
    %c0_48 = arith.constant 0 : index
    %c0_49 = arith.constant 0 : index
    %49 = vector.load %arg2[%c8, %c0_48, %c0_49] : memref<9x8x128xf32, #tpu.memory_space<vmem>>, vector<1x8x128xf32>
    %50 = vector.shape_cast %49 : vector<1x8x128xf32> to vector<8x128xf32>
    %cst_50 = arith.constant dense<0.000000e+00> : vector<112x128xf32>
    %51 = tpu.matmul %48, %50, %cst_50 {dimension_numbers = #tpu.dot_dimension_numbers<[1], [0], [0], [1], [0, 0, 1, 1], [], []>} : vector<112x8xf32>, vector<8x128xf32>, vector<112x128xf32> -> vector<112x128xf32>
    %52 = arith.addf %46, %51 : vector<112x128xf32>
    %c0_51 = arith.constant 0 : index
    %c0_52 = arith.constant 0 : index
    %53 = vector.load %arg3[%c0_51, %c0_52] : memref<1x128xf32, #tpu.memory_space<vmem>>, vector<1x128xf32>
    %54 = vector.broadcast %53 : vector<1x128xf32> to vector<112x128xf32>
    %55 = arith.addf %52, %54 : vector<112x128xf32>
    %cst_53 = arith.constant 0.000000e+00 : f32
    %56 = vector.broadcast %cst_53 : f32 to vector<112x128xf32>
    %57 = arith.maximumf %55, %56 : vector<112x128xf32>
    %c0_54 = arith.constant 0 : index
    %c0_55 = arith.constant 0 : index
    %58 = vector.load %arg4[%c0_54, %c0_55] : memref<112x1xf32, #tpu.memory_space<vmem>>, vector<112x1xf32>
    %59 = vector.broadcast %58 : vector<112x1xf32> to vector<112x128xf32>
    %60 = arith.mulf %57, %59 : vector<112x128xf32>
    %cst_56 = arith.constant 0.000000e+00 : f32
    %61 = vector.broadcast %cst_56 : f32 to vector<144x128xf32>
    %c0_57 = arith.constant 0 : index
    %c0_58 = arith.constant 0 : index
    %62 = vector.load %arg9[%c0_57, %c0_58] : memref<144x128xf32, #tpu.memory_space<vmem>>, vector<144x128xf32>
    tpu.vector_store %arg9[%c0_57, %c0_58], %61 {strides = array<i32>} : memref<144x128xf32, #tpu.memory_space<vmem>>, vector<144x128xf32>,
    %c16 = arith.constant 16 : index
    %c0_59 = arith.constant 0 : index
    %63 = vector.load %arg9[%c16, %c0_59] : memref<144x128xf32, #tpu.memory_space<vmem>>, vector<112x128xf32>
    tpu.vector_store %arg9[%c16, %c0_59], %60 {strides = array<i32>} : memref<144x128xf32, #tpu.memory_space<vmem>>, vector<112x128xf32>,
    %c5_60 = arith.constant 5 : index
    %c0_61 = arith.constant 0 : index
    %64 = vector.load %arg9[%c5_60, %c0_61] : memref<144x128xf32, #tpu.memory_space<vmem>>, vector<112x128xf32>
    %c0_62 = arith.constant 0 : index
    %c0_63 = arith.constant 0 : index
    %c0_64 = arith.constant 0 : index
    %65 = vector.load %arg5[%c0_62, %c0_63, %c0_64] : memref<9x128x128xf32, #tpu.memory_space<vmem>>, vector<1x128x128xf32>
    %66 = vector.shape_cast %65 : vector<1x128x128xf32> to vector<128x128xf32>
    %cst_65 = arith.constant dense<0.000000e+00> : vector<112x128xf32>
    %67 = tpu.matmul %64, %66, %cst_65 {dimension_numbers = #tpu.dot_dimension_numbers<[1], [0], [0], [1], [0, 0, 1, 1], [], []>} : vector<112x128xf32>, vector<128x128xf32>, vector<112x128xf32> -> vector<112x128xf32>
    %c6_66 = arith.constant 6 : index
    %c0_67 = arith.constant 0 : index
    %68 = vector.load %arg9[%c6_66, %c0_67] : memref<144x128xf32, #tpu.memory_space<vmem>>, vector<112x128xf32>
    %c1_68 = arith.constant 1 : index
    %c0_69 = arith.constant 0 : index
    %c0_70 = arith.constant 0 : index
    %69 = vector.load %arg5[%c1_68, %c0_69, %c0_70] : memref<9x128x128xf32, #tpu.memory_space<vmem>>, vector<1x128x128xf32>
    %70 = vector.shape_cast %69 : vector<1x128x128xf32> to vector<128x128xf32>
    %cst_71 = arith.constant dense<0.000000e+00> : vector<112x128xf32>
    %71 = tpu.matmul %68, %70, %cst_71 {dimension_numbers = #tpu.dot_dimension_numbers<[1], [0], [0], [1], [0, 0, 1, 1], [], []>} : vector<112x128xf32>, vector<128x128xf32>, vector<112x128xf32> -> vector<112x128xf32>
    %72 = arith.addf %67, %71 : vector<112x128xf32>
    %c7_72 = arith.constant 7 : index
    %c0_73 = arith.constant 0 : index
    %73 = vector.load %arg9[%c7_72, %c0_73] : memref<144x128xf32, #tpu.memory_space<vmem>>, vector<112x128xf32>
    %c2_74 = arith.constant 2 : index
    %c0_75 = arith.constant 0 : index
    %c0_76 = arith.constant 0 : index
    %74 = vector.load %arg5[%c2_74, %c0_75, %c0_76] : memref<9x128x128xf32, #tpu.memory_space<vmem>>, vector<1x128x128xf32>
    %75 = vector.shape_cast %74 : vector<1x128x128xf32> to vector<128x128xf32>
    %cst_77 = arith.constant dense<0.000000e+00> : vector<112x128xf32>
    %76 = tpu.matmul %73, %75, %cst_77 {dimension_numbers = #tpu.dot_dimension_numbers<[1], [0], [0], [1], [0, 0, 1, 1], [], []>} : vector<112x128xf32>, vector<128x128xf32>, vector<112x128xf32> -> vector<112x128xf32>
    %77 = arith.addf %72, %76 : vector<112x128xf32>
    %c15 = arith.constant 15 : index
    %c0_78 = arith.constant 0 : index
    %78 = vector.load %arg9[%c15, %c0_78] : memref<144x128xf32, #tpu.memory_space<vmem>>, vector<112x128xf32>
    %c3_79 = arith.constant 3 : index
    %c0_80 = arith.constant 0 : index
    %c0_81 = arith.constant 0 : index
    %79 = vector.load %arg5[%c3_79, %c0_80, %c0_81] : memref<9x128x128xf32, #tpu.memory_space<vmem>>, vector<1x128x128xf32>
    %80 = vector.shape_cast %79 : vector<1x128x128xf32> to vector<128x128xf32>
    %cst_82 = arith.constant dense<0.000000e+00> : vector<112x128xf32>
    %81 = tpu.matmul %78, %80, %cst_82 {dimension_numbers = #tpu.dot_dimension_numbers<[1], [0], [0], [1], [0, 0, 1, 1], [], []>} : vector<112x128xf32>, vector<128x128xf32>, vector<112x128xf32> -> vector<112x128xf32>
    %82 = arith.addf %77, %81 : vector<112x128xf32>
    %c16_83 = arith.constant 16 : index
    %c0_84 = arith.constant 0 : index
    %83 = vector.load %arg9[%c16_83, %c0_84] : memref<144x128xf32, #tpu.memory_space<vmem>>, vector<112x128xf32>
    %c4_85 = arith.constant 4 : index
    %c0_86 = arith.constant 0 : index
    %c0_87 = arith.constant 0 : index
    %84 = vector.load %arg5[%c4_85, %c0_86, %c0_87] : memref<9x128x128xf32, #tpu.memory_space<vmem>>, vector<1x128x128xf32>
    %85 = vector.shape_cast %84 : vector<1x128x128xf32> to vector<128x128xf32>
    %cst_88 = arith.constant dense<0.000000e+00> : vector<112x128xf32>
    %86 = tpu.matmul %83, %85, %cst_88 {dimension_numbers = #tpu.dot_dimension_numbers<[1], [0], [0], [1], [0, 0, 1, 1], [], []>} : vector<112x128xf32>, vector<128x128xf32>, vector<112x128xf32> -> vector<112x128xf32>
    %87 = arith.addf %82, %86 : vector<112x128xf32>
    %c17 = arith.constant 17 : index
    %c0_89 = arith.constant 0 : index
    %88 = vector.load %arg9[%c17, %c0_89] : memref<144x128xf32, #tpu.memory_space<vmem>>, vector<112x128xf32>
    %c5_90 = arith.constant 5 : index
    %c0_91 = arith.constant 0 : index
    %c0_92 = arith.constant 0 : index
    %89 = vector.load %arg5[%c5_90, %c0_91, %c0_92] : memref<9x128x128xf32, #tpu.memory_space<vmem>>, vector<1x128x128xf32>
    %90 = vector.shape_cast %89 : vector<1x128x128xf32> to vector<128x128xf32>
    %cst_93 = arith.constant dense<0.000000e+00> : vector<112x128xf32>
    %91 = tpu.matmul %88, %90, %cst_93 {dimension_numbers = #tpu.dot_dimension_numbers<[1], [0], [0], [1], [0, 0, 1, 1], [], []>} : vector<112x128xf32>, vector<128x128xf32>, vector<112x128xf32> -> vector<112x128xf32>
    %92 = arith.addf %87, %91 : vector<112x128xf32>
    %c25 = arith.constant 25 : index
    %c0_94 = arith.constant 0 : index
    %93 = vector.load %arg9[%c25, %c0_94] : memref<144x128xf32, #tpu.memory_space<vmem>>, vector<112x128xf32>
    %c6_95 = arith.constant 6 : index
    %c0_96 = arith.constant 0 : index
    %c0_97 = arith.constant 0 : index
    %94 = vector.load %arg5[%c6_95, %c0_96, %c0_97] : memref<9x128x128xf32, #tpu.memory_space<vmem>>, vector<1x128x128xf32>
    %95 = vector.shape_cast %94 : vector<1x128x128xf32> to vector<128x128xf32>
    %cst_98 = arith.constant dense<0.000000e+00> : vector<112x128xf32>
    %96 = tpu.matmul %93, %95, %cst_98 {dimension_numbers = #tpu.dot_dimension_numbers<[1], [0], [0], [1], [0, 0, 1, 1], [], []>} : vector<112x128xf32>, vector<128x128xf32>, vector<112x128xf32> -> vector<112x128xf32>
    %97 = arith.addf %92, %96 : vector<112x128xf32>
    %c26 = arith.constant 26 : index
    %c0_99 = arith.constant 0 : index
    %98 = vector.load %arg9[%c26, %c0_99] : memref<144x128xf32, #tpu.memory_space<vmem>>, vector<112x128xf32>
    %c7_100 = arith.constant 7 : index
    %c0_101 = arith.constant 0 : index
    %c0_102 = arith.constant 0 : index
    %99 = vector.load %arg5[%c7_100, %c0_101, %c0_102] : memref<9x128x128xf32, #tpu.memory_space<vmem>>, vector<1x128x128xf32>
    %100 = vector.shape_cast %99 : vector<1x128x128xf32> to vector<128x128xf32>
    %cst_103 = arith.constant dense<0.000000e+00> : vector<112x128xf32>
    %101 = tpu.matmul %98, %100, %cst_103 {dimension_numbers = #tpu.dot_dimension_numbers<[1], [0], [0], [1], [0, 0, 1, 1], [], []>} : vector<112x128xf32>, vector<128x128xf32>, vector<112x128xf32> -> vector<112x128xf32>
    %102 = arith.addf %97, %101 : vector<112x128xf32>
    %c27 = arith.constant 27 : index
    %c0_104 = arith.constant 0 : index
    %103 = vector.load %arg9[%c27, %c0_104] : memref<144x128xf32, #tpu.memory_space<vmem>>, vector<112x128xf32>
    %c8_105 = arith.constant 8 : index
    %c0_106 = arith.constant 0 : index
    %c0_107 = arith.constant 0 : index
    %104 = vector.load %arg5[%c8_105, %c0_106, %c0_107] : memref<9x128x128xf32, #tpu.memory_space<vmem>>, vector<1x128x128xf32>
    %105 = vector.shape_cast %104 : vector<1x128x128xf32> to vector<128x128xf32>
    %cst_108 = arith.constant dense<0.000000e+00> : vector<112x128xf32>
    %106 = tpu.matmul %103, %105, %cst_108 {dimension_numbers = #tpu.dot_dimension_numbers<[1], [0], [0], [1], [0, 0, 1, 1], [], []>} : vector<112x128xf32>, vector<128x128xf32>, vector<112x128xf32> -> vector<112x128xf32>
    %107 = arith.addf %102, %106 : vector<112x128xf32>
    %c0_109 = arith.constant 0 : index
    %c0_110 = arith.constant 0 : index
    %108 = vector.load %arg6[%c0_109, %c0_110] : memref<1x128xf32, #tpu.memory_space<vmem>>, vector<1x128xf32>
    %109 = vector.broadcast %108 : vector<1x128xf32> to vector<112x128xf32>
    %110 = arith.addf %107, %109 : vector<112x128xf32>
    %c0_111 = arith.constant 0 : index
    %c0_112 = arith.constant 0 : index
    %111 = vector.load %arg7[%c0_111, %c0_112] : memref<112x128xf32, #tpu.memory_space<vmem>>, vector<112x128xf32>
    %112 = arith.addf %110, %111 : vector<112x128xf32>
    %cst_113 = arith.constant 0.000000e+00 : f32
    %113 = vector.broadcast %cst_113 : f32 to vector<112x128xf32>
    %114 = arith.maximumf %112, %113 : vector<112x128xf32>
    %c0_114 = arith.constant 0 : index
    %c0_115 = arith.constant 0 : index
    %115 = vector.load %arg8[%c0_114, %c0_115] : memref<112x128xf32, #tpu.memory_space<vmem>>, vector<112x128xf32>
    tpu.vector_store %arg8[%c0_114, %c0_115], %114 {strides = array<i32>} : memref<112x128xf32, #tpu.memory_space<vmem>>, vector<112x128xf32>,
    return
  }
  func.func @transform_0(%arg0: i32) -> (i32, i32, i32) {
    %c0_i32 = arith.constant 0 : i32
    %c0_i32_0 = arith.constant 0 : i32
    %c0_i32_1 = arith.constant 0 : i32
    return %c0_i32, %arg0, %c0_i32_0 : i32, i32, i32
  }
  func.func @transform_1(%arg0: i32) -> (i32, i32, i32) {
    %c0_i32 = arith.constant 0 : i32
    %c0_i32_0 = arith.constant 0 : i32
    %c0_i32_1 = arith.constant 0 : i32
    %c0_i32_2 = arith.constant 0 : i32
    return %c0_i32, %c0_i32_0, %c0_i32_1 : i32, i32, i32
  }
  func.func @transform_2(%arg0: i32) -> (i32, i32) {
    %c0_i32 = arith.constant 0 : i32
    %c0_i32_0 = arith.constant 0 : i32
    %c0_i32_1 = arith.constant 0 : i32
    return %c0_i32, %c0_i32_0 : i32, i32
  }
  func.func @transform_3(%arg0: i32) -> (i32, i32) {
    %c0_i32 = arith.constant 0 : i32
    %c0_i32_0 = arith.constant 0 : i32
    %c0_i32_1 = arith.constant 0 : i32
    return %c0_i32, %c0_i32_0 : i32, i32
  }
  func.func @transform_4(%arg0: i32) -> (i32, i32, i32) {
    %c0_i32 = arith.constant 0 : i32
    %c0_i32_0 = arith.constant 0 : i32
    %c0_i32_1 = arith.constant 0 : i32
    %c0_i32_2 = arith.constant 0 : i32
    return %c0_i32, %c0_i32_0, %c0_i32_1 : i32, i32, i32
  }
  func.func @transform_5(%arg0: i32) -> (i32, i32) {
    %c0_i32 = arith.constant 0 : i32
    %c0_i32_0 = arith.constant 0 : i32
    %c0_i32_1 = arith.constant 0 : i32
    return %c0_i32, %c0_i32_0 : i32, i32
  }
  func.func @transform_6(%arg0: i32) -> (i32, i32) {
    %c0_i32 = arith.constant 0 : i32
    %c0_i32_0 = arith.constant 0 : i32
    return %arg0, %c0_i32 : i32, i32
  }
  func.func @transform_7(%arg0: i32) -> (i32, i32) {
    %c0_i32 = arith.constant 0 : i32
    %c0_i32_0 = arith.constant 0 : i32
    return %arg0, %c0_i32 : i32, i32
  }
}

</mosaic_0001>

<bundles_post_ra>
// kernel: basic_block_forward.1
= control target key start
LH: loop header
LB: loop body
LE: loop exit
PB: predicated region body
PF: predicated region fallthrough
CT: control target
= control target key end

     0   :  { %s6378_s24 = smov 0   ;;  %s6380_s25 = smov 0   ;;  %s7498_s0 = inlined_call_operand.vmem [shape: f32[4,256,8], index: 0, kind: input, shape index: {}]   ;;  %s7499_s1 = inlined_call_operand.vmem [shape: f32[9,8,128], index: 1, kind: input, shape index: {}]   ;;  %s7500_s2 = inlined_call_operand.vmem [shape: f32[1,128], index: 2, kind: input, shape index: {}]   ;;  %s7501_s3 = inlined_call_operand.vmem [shape: f32[112,1], index: 3, kind: input, shape index: {}]   ;;  %s7502_s4 = inlined_call_operand.vmem [shape: f32[9,128,128], index: 4, kind: input, shape index: {}]   ;;  %s7503_s5 = inlined_call_operand.vmem [shape: f32[1,128], index: 5, kind: input, shape index: {}]   ;;  %s7504_s6 = inlined_call_operand.vmem [shape: f32[224,128], index: 6, kind: input, shape index: {}]   ;;  %s7505_s7 = inlined_call_operand.vmem [shape: f32[224,128], index: 7, kind: output, shape index: {}]  }
   0x1   :  { %s6382_s26 = smov 0  }
   0x2 LB: > { %s4335_s27 = sadd.s32 4294967295, %s6334_s26   ;;  %s6395_s28 = sadd.s32 1, %s6334_s26   ;;  %s6334_s26 = sphi %s6382_s26, %s7508_s26   ;;  %s6330_s25 = sphi %s6380_s25, %s7507_s25   ;;  %s6326_s24 = sphi %s6378_s24, %s7506_s24  }
   0x3   : > { %s21_s29 = ssub.s32 %s6334_s26, %s6395_s28  ;;  %s24_s30 = sadd.s32 1, %s6330_s25 }
   0x4   : > { %p22_p0 = scmp.eq.s32.totalorder %s21_s29, 0  ;;  %p31_p1 = scmp.ne.s32.totalorder %s6330_s25, %s6326_s24 }
   0x5   : > { %p32_p2 = scmp.eq.s32.totalorder %s6334_s26, 0  ;;  %p4338_p4 = scmp.ge.s32.totalorder %s6334_s26, 2 }
   0x6   : > { %s6404_s8 = scalar_select %p22_p0, %s6330_s25, %s24_s30  }
   0x7   : > { %p33_p3 = por %p32_p2, %p31_p1  ;;  %229 = sbr.rel (%p4338_p4) target bundleno = 50 (0x32), region = 36 }
   0xe   : > { %232 = sbr.rel (!%p33_p3) target bundleno = 50 (0x32), region = 40  ;;  %s234_s9 = sand.u32 (%p33_p3), 1, %s6330_s25  }
   0xf   : > { %s4682_s10 = sshll.u32 (%p33_p3), %s6334_s26, 7  ;;  %s4339_s11 = sshll.u32 (%p33_p3), %s234_s9, 9 }
  0x10   : > { %s6412_s14 = scalar_lea.vmem (%p33_p3), %s7498_s0, %s4682_s10  ;;  %s6417_s15 = scalar_lea.vmem (%p33_p3), [#allocation3], %s4339_s11 }
  0x11   : > { %v393_v0 = vld [vmem:[%s6412_s14] sm:$0xff] (%p33_p3)  ;;  %v395_v1 = vld [vmem:[%s6412_s14 + $0x8] sm:$0xff] (%p33_p3)  ;;  %v397_v2 = vld [vmem:[%s6412_s14 + $0x10] sm:$0xff] (%p33_p3) }
  0x12   : > { %394 = vst [vmem:[%s6417_s15] sm:$0xff] (%p33_p3), %v393_v0  ;;  %396 = vst [vmem:[%s6417_s15 + $0x8] sm:$0xff] (%p33_p3), %v395_v1  ;;  %v399_v3 = vld [vmem:[%s6412_s14 + $0x18] sm:$0xff] (%p33_p3)  ;;  %v401_v4 = vld [vmem:[%s6412_s14 + $0x20] sm:$0xff] (%p33_p3) }
  0x13   : > { %398 = vst [vmem:[%s6417_s15 + $0x10] sm:$0xff] (%p33_p3), %v397_v2  ;;  %v403_v5 = vld [vmem:[%s6412_s14 + $0x28] sm:$0xff] (%p33_p3)  ;;  %400 = vst [vmem:[%s6417_s15 + $0x18] sm:$0xff] (%p33_p3), %v399_v3  ;;  %v405_v6 = vld [vmem:[%s6412_s14 + $0x30] sm:$0xff] (%p33_p3) }
  0x14   : > { %402 = vst [vmem:[%s6417_s15 + $0x20] sm:$0xff] (%p33_p3), %v401_v4  ;;  %404 = vst [vmem:[%s6417_s15 + $0x28] sm:$0xff] (%p33_p3), %v403_v5  ;;  %v407_v7 = vld [vmem:[%s6412_s14 + $0x38] sm:$0xff] (%p33_p3)  ;;  %v409_v8 = vld [vmem:[%s6412_s14 + $0x40] sm:$0xff] (%p33_p3) }
  0x15   : > { %406 = vst [vmem:[%s6417_s15 + $0x30] sm:$0xff] %v405_v6  ;;  %408 = vst [vmem:[%s6417_s15 + $0x38] sm:$0xff] %v407_v7  ;;  %v411_v9 = vld [vmem:[%s6412_s14 + $0x48] sm:$0xff]  ;;  %v413_v10 = vld [vmem:[%s6412_s14 + $0x50] sm:$0xff] }
  0x16   : > { %410 = vst [vmem:[%s6417_s15 + $0x40] sm:$0xff] %v409_v8  ;;  %v415_v11 = vld [vmem:[%s6412_s14 + $0x58] sm:$0xff]  ;;  %412 = vst [vmem:[%s6417_s15 + $0x48] sm:$0xff] %v411_v9  ;;  %v417_v12 = vld [vmem:[%s6412_s14 + $0x60] sm:$0xff] }
  0x17   : > { %414 = vst [vmem:[%s6417_s15 + $0x50] sm:$0xff] %v413_v10  ;;  %416 = vst [vmem:[%s6417_s15 + $0x58] sm:$0xff] %v415_v11  ;;  %v419_v13 = vld [vmem:[%s6412_s14 + $0x68] sm:$0xff]  ;;  %v421_v14 = vld [vmem:[%s6412_s14 + $0x70] sm:$0xff] }
  0x18   : > { %418 = vst [vmem:[%s6417_s15 + $0x60] sm:$0xff] %v417_v12  ;;  %420 = vst [vmem:[%s6417_s15 + $0x68] sm:$0xff] %v419_v13  ;;  %v423_v15 = vld [vmem:[%s6412_s14 + $0x78] sm:$0xff]  ;;  %v425_v16 = vld [vmem:[%s6412_s14 + $0x100] sm:$0xff] }
  0x19   : > { %422 = vst [vmem:[%s6417_s15 + $0x70] sm:$0xff] %v421_v14  ;;  %v427_v17 = vld [vmem:[%s6412_s14 + $0x108] sm:$0xff]  ;;  %424 = vst [vmem:[%s6417_s15 + $0x78] sm:$0xff] %v423_v15  ;;  %v429_v18 = vld [vmem:[%s6412_s14 + $0x110] sm:$0xff] }
  0x1a   : > { %426 = vst [vmem:[%s6417_s15 + $0x80] sm:$0xff] %v425_v16  ;;  %428 = vst [vmem:[%s6417_s15 + $0x88] sm:$0xff] %v427_v17  ;;  %v431_v19 = vld [vmem:[%s6412_s14 + $0x118] sm:$0xff]  ;;  %v433_v20 = vld [vmem:[%s6412_s14 + $0x120] sm:$0xff] }
  0x1b   : > { %430 = vst [vmem:[%s6417_s15 + $0x90] sm:$0xff] %v429_v18  ;;  %432 = vst [vmem:[%s6417_s15 + $0x98] sm:$0xff] %v431_v19  ;;  %v435_v21 = vld [vmem:[%s6412_s14 + $0x128] sm:$0xff]  ;;  %v437_v22 = vld [vmem:[%s6412_s14 + $0x130] sm:$0xff] }
  0x1c   : > { %434 = vst [vmem:[%s6417_s15 + $0xa0] sm:$0xff] %v433_v20  ;;  %v439_v23 = vld [vmem:[%s6412_s14 + $0x138] sm:$0xff]  ;;  %436 = vst [vmem:[%s6417_s15 + $0xa8] sm:$0xff] %v435_v21  ;;  %v441_v24 = vld [vmem:[%s6412_s14 + $0x140] sm:$0xff] }
  0x1d   : > { %438 = vst [vmem:[%s6417_s15 + $0xb0] sm:$0xff] %v437_v22  ;;  %440 = vst [vmem:[%s6417_s15 + $0xb8] sm:$0xff] %v439_v23  ;;  %v443_v25 = vld [vmem:[%s6412_s14 + $0x148] sm:$0xff]  ;;  %v445_v26 = vld [vmem:[%s6412_s14 + $0x150] sm:$0xff] }
  0x1e   : > { %442 = vst [vmem:[%s6417_s15 + $0xc0] sm:$0xff] %v441_v24  ;;  %444 = vst [vmem:[%s6417_s15 + $0xc8] sm:$0xff] %v443_v25  ;;  %v447_v27 = vld [vmem:[%s6412_s14 + $0x158] sm:$0xff]  ;;  %v449_v28 = vld [vmem:[%s6412_s14 + $0x160] sm:$0xff] }
  0x1f   : > { %446 = vst [vmem:[%s6417_s15 + $0xd0] sm:$0xff] %v445_v26  ;;  %v451_v29 = vld [vmem:[%s6412_s14 + $0x168] sm:$0xff]  ;;  %448 = vst [vmem:[%s6417_s15 + $0xd8] sm:$0xff] %v447_v27  ;;  %v453_v30 = vld [vmem:[%s6412_s14 + $0x170] sm:$0xff] }
  0x20   : > { %450 = vst [vmem:[%s6417_s15 + $0xe0] sm:$0xff] %v449_v28  ;;  %452 = vst [vmem:[%s6417_s15 + $0xe8] sm:$0xff] %v451_v29  ;;  %v455_v31 = vld [vmem:[%s6412_s14 + $0x178] sm:$0xff]  ;;  %v457_v32 = vld [vmem:[%s6412_s14 + $0x200] sm:$0xff] }
  0x21   : > { %454 = vst [vmem:[%s6417_s15 + $0xf0] sm:$0xff] %v453_v30  ;;  %456 = vst [vmem:[%s6417_s15 + $0xf8] sm:$0xff] %v455_v31  ;;  %v459_v33 = vld [vmem:[%s6412_s14 + $0x208] sm:$0xff]  ;;  %v461_v34 = vld [vmem:[%s6412_s14 + $0x210] sm:$0xff] }
  0x22   : > { %458 = vst [vmem:[%s6417_s15 + $0x100] sm:$0xff] %v457_v32  ;;  %v463_v35 = vld [vmem:[%s6412_s14 + $0x218] sm:$0xff]  ;;  %460 = vst [vmem:[%s6417_s15 + $0x108] sm:$0xff] %v459_v33  ;;  %v465_v36 = vld [vmem:[%s6412_s14 + $0x220] sm:$0xff] }
  0x23   : > { %462 = vst [vmem:[%s6417_s15 + $0x110] sm:$0xff] %v461_v34  ;;  %464 = vst [vmem:[%s6417_s15 + $0x118] sm:$0xff] %v463_v35  ;;  %v467_v37 = vld [vmem:[%s6412_s14 + $0x228] sm:$0xff]  ;;  %v469_v38 = vld [vmem:[%s6412_s14 + $0x230] sm:$0xff] }
  0x24   : > { %466 = vst [vmem:[%s6417_s15 + $0x120] sm:$0xff] %v465_v36  ;;  %468 = vst [vmem:[%s6417_s15 + $0x128] sm:$0xff] %v467_v37  ;;  %v471_v39 = vld [vmem:[%s6412_s14 + $0x238] sm:$0xff]  ;;  %v473_v40 = vld [vmem:[%s6412_s14 + $0x240] sm:$0xff] }
  0x25   : > { %470 = vst [vmem:[%s6417_s15 + $0x130] sm:$0xff] %v469_v38  ;;  %v475_v41 = vld [vmem:[%s6412_s14 + $0x248] sm:$0xff]  ;;  %472 = vst [vmem:[%s6417_s15 + $0x138] sm:$0xff] %v471_v39  ;;  %v477_v42 = vld [vmem:[%s6412_s14 + $0x250] sm:$0xff] }
  0x26   : > { %474 = vst [vmem:[%s6417_s15 + $0x140] sm:$0xff] %v473_v40  ;;  %476 = vst [vmem:[%s6417_s15 + $0x148] sm:$0xff] %v475_v41  ;;  %v479_v43 = vld [vmem:[%s6412_s14 + $0x258] sm:$0xff]  ;;  %v481_v44 = vld [vmem:[%s6412_s14 + $0x260] sm:$0xff] }
  0x27   : > { %478 = vst [vmem:[%s6417_s15 + $0x150] sm:$0xff] %v477_v42  ;;  %480 = vst [vmem:[%s6417_s15 + $0x158] sm:$0xff] %v479_v43  ;;  %v483_v45 = vld [vmem:[%s6412_s14 + $0x268] sm:$0xff]  ;;  %v485_v46 = vld [vmem:[%s6412_s14 + $0x270] sm:$0xff] }
  0x28   : > { %482 = vst [vmem:[%s6417_s15 + $0x160] sm:$0xff] %v481_v44  ;;  %v487_v47 = vld [vmem:[%s6412_s14 + $0x278] sm:$0xff]  ;;  %484 = vst [vmem:[%s6417_s15 + $0x168] sm:$0xff] %v483_v45  ;;  %v489_v48 = vld [vmem:[%s6412_s14 + $0x300] sm:$0xff] }
  0x29   : > { %486 = vst [vmem:[%s6417_s15 + $0x170] sm:$0xff] %v485_v46  ;;  %488 = vst [vmem:[%s6417_s15 + $0x178] sm:$0xff] %v487_v47  ;;  %v491_v49 = vld [vmem:[%s6412_s14 + $0x308] sm:$0xff]  ;;  %v493_v50 = vld [vmem:[%s6412_s14 + $0x310] sm:$0xff] }
  0x2a   : > { %490 = vst [vmem:[%s6417_s15 + $0x180] sm:$0xff] %v489_v48  ;;  %492 = vst [vmem:[%s6417_s15 + $0x188] sm:$0xff] %v491_v49  ;;  %v495_v51 = vld [vmem:[%s6412_s14 + $0x318] sm:$0xff]  ;;  %v497_v52 = vld [vmem:[%s6412_s14 + $0x320] sm:$0xff] }
  0x2b   : > { %494 = vst [vmem:[%s6417_s15 + $0x190] sm:$0xff] %v493_v50  ;;  %v499_v53 = vld [vmem:[%s6412_s14 + $0x328] sm:$0xff]  ;;  %496 = vst [vmem:[%s6417_s15 + $0x198] sm:$0xff] %v495_v51  ;;  %v501_v54 = vld [vmem:[%s6412_s14 + $0x330] sm:$0xff] }
  0x2c   : > { %498 = vst [vmem:[%s6417_s15 + $0x1a0] sm:$0xff] %v497_v52  ;;  %500 = vst [vmem:[%s6417_s15 + $0x1a8] sm:$0xff] %v499_v53  ;;  %v503_v55 = vld [vmem:[%s6412_s14 + $0x338] sm:$0xff]  ;;  %v505_v56 = vld [vmem:[%s6412_s14 + $0x340] sm:$0xff] }
  0x2d   : > { %502 = vst [vmem:[%s6417_s15 + $0x1b0] sm:$0xff] %v501_v54  ;;  %504 = vst [vmem:[%s6417_s15 + $0x1b8] sm:$0xff] %v503_v55  ;;  %v507_v57 = vld [vmem:[%s6412_s14 + $0x348] sm:$0xff]  ;;  %v509_v58 = vld [vmem:[%s6412_s14 + $0x350] sm:$0xff] }
  0x2e   : > { %506 = vst [vmem:[%s6417_s15 + $0x1c0] sm:$0xff] %v505_v56  ;;  %v511_v59 = vld [vmem:[%s6412_s14 + $0x358] sm:$0xff]  ;;  %508 = vst [vmem:[%s6417_s15 + $0x1c8] sm:$0xff] %v507_v57  ;;  %v513_v60 = vld [vmem:[%s6412_s14 + $0x360] sm:$0xff] }
  0x2f   : > { %510 = vst [vmem:[%s6417_s15 + $0x1d0] sm:$0xff] %v509_v58  ;;  %512 = vst [vmem:[%s6417_s15 + $0x1d8] sm:$0xff] %v511_v59  ;;  %v515_v61 = vld [vmem:[%s6412_s14 + $0x368] sm:$0xff]  ;;  %v517_v62 = vld [vmem:[%s6412_s14 + $0x370] sm:$0xff] }
  0x30   : > { %514 = vst [vmem:[%s6417_s15 + $0x1e0] sm:$0xff] %v513_v60  ;;  %516 = vst [vmem:[%s6417_s15 + $0x1e8] sm:$0xff] %v515_v61  ;;  %v519_v63 = vld [vmem:[%s6412_s14 + $0x378] sm:$0xff] }
  0x31   : > { %518 = vst [vmem:[%s6417_s15 + $0x1f0] sm:$0xff] %v517_v62  ;;  %520 = vst [vmem:[%s6417_s15 + $0x1f8] sm:$0xff] %v519_v63 }
  0x32 PF: > { %p4342_p5 = scmp.ge.s32.totalorder %s6334_s26, 1  ;;  %p534_p6 = scmp.lt.s32.totalorder %s6334_s26, 3 }
  0x34   : > { %p535_p7 = pnand %p4342_p5, %p534_p6 }
  0x35   : > { %v4360_v0 = vld [vmem:[%s7499_s1 + $0x8] sm:$0xff] (!%p535_p7)  ;;  %s541_s18 = sand.u32 (!%p535_p7), 1, %s6326_s24   ;;  %v604_v1 = vld [vmem:[%s7499_s1] sm:$0xff] (!%p535_p7)  ;;  %vm622_vm0 = vcmask (!%p535_p7), 64512   ;;  %v4389_v5 = vld [vmem:[%s7499_s1 + $0x10] sm:$0xff] (!%p535_p7)  ;;  %s578_s17 = smul.u32 (!%p535_p7), 14, %s4335_s27 }
  0x36   : > { %538 = sbr.rel (%p535_p7) target bundleno = 980 (0x3d4), region = 82  ;;  %5088 = vmatprep.subr.mxu0 (!%p535_p7), %v4360_v0  ;;  %s4343_s21 = sshll.u32 (!%p535_p7), %s541_s18, 9  ;;  %v4418_v20 = vld [vmem:[%s7499_s1 + $0x18] sm:$0xff] (!%p535_p7)  ;;  %v4447_v35 = vld [vmem:[%s7499_s1 + $0x20] sm:$0xff] (!%p535_p7)  ;;  %v4476_v50 = vld [vmem:[%s7499_s1 + $0x28] sm:$0xff] (!%p535_p7) }
  0x37   : > { %5089 = vmatpush3.msra.mxu0 (!%p535_p7), %v4360_v0  ;;  %s6553_s22 = scalar_lea.vmem (!%p535_p7), [#allocation3], %s4343_s21  ;;  %p579_p8 = scmp.lt.s32.totalorder (!%p535_p7), %s578_s17, 27 }
  0x38   : > { %v4346_v2 = vld [vmem:[%s6553_s22 + $0x80] sm:$0xff] (!%p535_p7)  ;;  %5111 = vmatprep.subr.mxu0 (!%p535_p7), %v604_v1  ;;  %v4347_v3 = vld [vmem:[%s6553_s22 + $0x88] sm:$0xff] (!%p535_p7)  ;;  %v4348_v4 = vld [vmem:[%s6553_s22 + $0x90] sm:$0xff] (!%p535_p7) }
  0x39   : > { %5090 = vmatprep.mubr.msk.f32.mxu0 (!%p535_p7), %vm622_vm0, %v4346_v2  ;;  %v4349_v6 = vld [vmem:[%s6553_s22 + $0x98] sm:$0xff] (!%p535_p7)  ;;  %v4350_v7 = vld [vmem:[%s6553_s22 + $0xa0] sm:$0xff] (!%p535_p7)  ;;  %v4351_v8 = vld [vmem:[%s6553_s22 + $0xa8] sm:$0xff] (!%p535_p7) }
  0x3a   : > { %5091 = vmatmul.mubr.msk.f32.vlgmr.msra.gmra.mrb[0].mxu0 (!%p535_p7), %vm622_vm0, %v4347_v3  ;;  %v4352_v9 = vld [vmem:[%s6553_s22 + $0xb0] sm:$0xff] (!%p535_p7)  ;;  %v4353_v10 = vld [vmem:[%s6553_s22 + $0xb8] sm:$0xff] (!%p535_p7)  ;;  %v4354_v11 = vld [vmem:[%s6553_s22 + $0xc0] sm:$0xff] (!%p535_p7) }
  0x3b   : > { %5112 = vmatpush3.msra.mxu0 (!%p535_p7), %v604_v1  ;;  %5093 = vmatprep.mubr.msk.f32.mxu0 (!%p535_p7), %vm622_vm0, %v4348_v4  ;;  %v4355_v12 = vld [vmem:[%s6553_s22 + $0xc8] sm:$0xff] (!%p535_p7)  ;;  %v4356_v13 = vld [vmem:[%s6553_s22 + $0xd0] sm:$0xff] (!%p535_p7)  ;;  %v4357_v14 = vld [vmem:[%s6553_s22 + $0xd8] sm:$0xff] (!%p535_p7) }
  0x3c   : > { %5134 = vmatprep.subr.mxu0 (!%p535_p7), %v4389_v5  ;;  %v4358_v15 = vld [vmem:[%s6553_s22 + $0xe0] sm:$0xff] (!%p535_p7)  ;;  %v4359_v16 = vld [vmem:[%s6553_s22 + $0xe8] sm:$0xff] (!%p535_p7)  ;;  %v592_v19 = vld [vmem:[%s6553_s22 + $0x10] sm:$0xff] (!%p535_p7) }
  0x3d   : > { %v590_v17 = vld [vmem:[%s6553_s22] sm:$0xff]  ;;  %v591_v18 = vld [vmem:[%s6553_s22 + $0x8] sm:$0xff]  ;;  %v593_v21 = vld [vmem:[%s6553_s22 + $0x18] sm:$0xff]  ;;  %s7510_s17 = smov (!%p579_p8, %s578_s17), 27 }
  0x3e   : > { %5094 = vmatmul.mubr.msk.f32.gmra.mrb[2].mxu0 %vm622_vm0, %v4349_v6  ;;  %v594_v22 = vld [vmem:[%s6553_s22 + $0x20] sm:$0xff]  ;;  %v595_v23 = vld [vmem:[%s6553_s22 + $0x28] sm:$0xff]  ;;  %v596_v24 = vld [vmem:[%s6553_s22 + $0x30] sm:$0xff]  ;;  %s4344_s18 = sshll.u32 %s7510_s17, 3 }
  0x3f   : > { %5096 = vmatprep.mubr.msk.f32.mxu0 %vm622_vm0, %v4350_v7  ;;  %v597_v25 = vld [vmem:[%s6553_s22 + $0x38] sm:$0xff]  ;;  %v598_v26 = vld [vmem:[%s6553_s22 + $0x40] sm:$0xff]  ;;  %v599_v27 = vld [vmem:[%s6553_s22 + $0x48] sm:$0xff]  ;;  %s7422_s21 = scalar_lea.vmem %s7504_s6, %s4344_s18  ;;  %s7437_s24 = scalar_lea.vmem %s7505_s7, %s4344_s18 }
  0x40   : > { %v600_v28 = vld [vmem:[%s6553_s22 + $0x50] sm:$0xff]  ;;  %v601_v29 = vld [vmem:[%s6553_s22 + $0x58] sm:$0xff]  ;;  %v602_v30 = vld [vmem:[%s6553_s22 + $0x60] sm:$0xff] }
  0x41   : > { %v603_v31 = vld [vmem:[%s6553_s22 + $0x68] sm:$0xff]  ;;  %v979_v34 = vld [vmem:[%s6553_s22 + $0x11] sm:$0xff]  ;;  %v980_v36 = vld [vmem:[%s6553_s22 + $0x19] sm:$0xff] }
  0x42   : > { %5097 = vmatmul.mubr.msk.f32.gmra.mrb[4].mxu0 %vm622_vm0, %v4351_v8  ;;  %v977_v32 = vld [vmem:[%s6553_s22 + $0x1] sm:$0xff]  ;;  %v978_v33 = vld [vmem:[%s6553_s22 + $0x9] sm:$0xff]  ;;  %v983_v39 = vld [vmem:[%s6553_s22 + $0x31] sm:$0xff] }
  0x43   : > { %5099 = vmatprep.mubr.msk.f32.mxu0 %vm622_vm0, %v4352_v9  ;;  %v981_v37 = vld [vmem:[%s6553_s22 + $0x21] sm:$0xff]  ;;  %v982_v38 = vld [vmem:[%s6553_s22 + $0x29] sm:$0xff]  ;;  %v984_v40 = vld [vmem:[%s6553_s22 + $0x39] sm:$0xff]  ;;  %v6336_v9 = vmov 0  }
  0x44   : > { %v985_v41 = vld [vmem:[%s6553_s22 + $0x41] sm:$0xff]  ;;  %v986_v42 = vld [vmem:[%s6553_s22 + $0x49] sm:$0xff]  ;;  %v987_v43 = vld [vmem:[%s6553_s22 + $0x51] sm:$0xff]  ;;  %6310 = vset.pattern.permute.xlu0 %v6336_v9  ;;  %6311 = vset.pattern.permute.xlu1 %v6336_v9 }
  0x45   : > { %v988_v44 = vld [vmem:[%s6553_s22 + $0x59] sm:$0xff]  ;;  %v989_v45 = vld [vmem:[%s6553_s22 + $0x61] sm:$0xff]  ;;  %v990_v46 = vld [vmem:[%s6553_s22 + $0x69] sm:$0xff] }
  0x46   : > { %5100 = vmatmul.mubr.msk.f32.gmra.mrb[6].mxu0 %vm622_vm0, %v4353_v10  ;;  %v4404_v47 = vld [vmem:[%s6553_s22 + $0x100] sm:$0xff]  ;;  %v4405_v48 = vld [vmem:[%s6553_s22 + $0x108] sm:$0xff]  ;;  %v4406_v49 = vld [vmem:[%s6553_s22 + $0x110] sm:$0xff] }
  0x47   : > { %5102 = vmatprep.mubr.msk.f32.mxu0 %vm622_vm0, %v4354_v11  ;;  %v4407_v51 = vld [vmem:[%s6553_s22 + $0x118] sm:$0xff]  ;;  %v4408_v52 = vld [vmem:[%s6553_s22 + $0x120] sm:$0xff]  ;;  %v4409_v53 = vld [vmem:[%s6553_s22 + $0x128] sm:$0xff] }
  0x48   : > { %v4410_v54 = vld [vmem:[%s6553_s22 + $0x130] sm:$0xff]  ;;  %v4411_v55 = vld [vmem:[%s6553_s22 + $0x138] sm:$0xff]  ;;  %v4412_v56 = vld [vmem:[%s6553_s22 + $0x140] sm:$0xff] }
  0x49   : > { %v4413_v57 = vld [vmem:[%s6553_s22 + $0x148] sm:$0xff]  ;;  %v4414_v58 = vld [vmem:[%s6553_s22 + $0x150] sm:$0xff]  ;;  %v4415_v59 = vld [vmem:[%s6553_s22 + $0x158] sm:$0xff] }
  0x4a   : > { %5103 = vmatmul.mubr.msk.f32.gmra.mrb[8].mxu0 %vm622_vm0, %v4355_v12  ;;  %v4416_v60 = vld [vmem:[%s6553_s22 + $0x160] sm:$0xff]  ;;  %v4417_v61 = vld [vmem:[%s6553_s22 + $0x168] sm:$0xff]  ;;  %v4435_v0 = vld [vmem:[%s6553_s22 + $0x190] sm:$0xff] }
  0x4b   : > { %5105 = vmatprep.mubr.msk.f32.mxu0 %vm622_vm0, %v4356_v13  ;;  %v4433_v62 = vld [vmem:[%s6553_s22 + $0x180] sm:$0xff]  ;;  %v4434_v63 = vld [vmem:[%s6553_s22 + $0x188] sm:$0xff]  ;;  %v4436_v2 = vld [vmem:[%s6553_s22 + $0x198] sm:$0xff] }
  0x4c   : > { %v6686_v1 = vld [vmem:[%s7499_s1 + $0x30] sm:$0xff]  ;;  %v4438_v4 = vld [vmem:[%s6553_s22 + $0x1a8] sm:$0xff]  ;;  %v2463_v6 = vld [vmem:[%s7501_s3] sm:$0xff] }
  0x4d   : > { %v4437_v3 = vld [vmem:[%s6553_s22 + $0x1a0] sm:$0xff]  ;;  %v4440_v8 = vld [vmem:[%s6553_s22 + $0x1b8] sm:$0xff]  ;;  %2479 = vperm.xlu0 %6310, %v2463_v6   ;;  %v2466_v12 = vld [vmem:[%s7501_s3 + $0x18] sm:$0xff] }
  0x4e   : > { %5106 = vmatmul.mubr.msk.f32.gmra.mrb[10].mxu0 %vm622_vm0, %v4357_v14  ;;  %v2465_v7 = vld [vmem:[%s7501_s3 + $0x10] sm:$0xff]  ;;  %v2464_v11 = vld [vmem:[%s7501_s3 + $0x8] sm:$0xff]  ;;  %v2607_v13 = vld [vmem:[%s7502_s4] sm:$0xff] }
  0x4f   : > { %5108 = vmatprep.mubr.msk.f32.mxu0 %vm622_vm0, %v4358_v15  ;;  %v4441_v10 = vld [vmem:[%s6553_s22 + $0x1c0] sm:$0xff]  ;;  %2489 = vperm.xlu1 %6311, %v2465_v7   ;;  %v4442_v14 = vld [vmem:[%s6553_s22 + $0x1c8] sm:$0xff]  ;;  %v2608_v15 = vld [vmem:[%s7502_s4 + $0x8] sm:$0xff] }
  0x50   : > { %v1818_v6 = vld [vmem:[%s6553_s22 + $0x62] sm:$0xff]  ;;  %v1819_v7 = vld [vmem:[%s6553_s22 + $0x6a] sm:$0xff] }
  0x51   : > { %2484 = vperm.xlu0 %6310, %v2464_v11   ;;  %v4506_v9 = vld [vmem:[%s6553_s22 + $0x8a] sm:$0xff]  ;;  %v4552_v11 = vld [vmem:[%s7502_s4 + $0x88] sm:$0xff] }
  0x52   : > { %5109 = vmatmul.mubr.msk.f32.gmra.mrb[12].mxu0 %vm622_vm0, %v4359_v16  ;;  %v4443_v16 = vld [vmem:[%s6553_s22 + $0x1d0] sm:$0xff] }
  0x53   : > { %5113 = vmatprep.mubr.msk.f32.mxu0 %vm622_vm0, %v590_v17  ;;  %v5804_v17 = vpack.c.bf16 %v2608_v15, %v2607_v13  ;;  %2494 = vperm.xlu1 %6311, %v2466_v12   ;;  %v4507_v12 = vld [vmem:[%s6553_s22 + $0x92] sm:$0xff]  ;;  %v4508_v13 = vld [vmem:[%s6553_s22 + $0x9a] sm:$0xff]  ;;  %v4509_v15 = vld [vmem:[%s6553_s22 + $0xa2] sm:$0xff] }
  0x55   : > { %5805 = vmatprep.subr.bf16.mxu1 %v5804_v17 }
  0x56   : > { %5114 = vmatmul.mubr.msk.f32.vlgmr.msra.gmra.mrb[0].mxu0 %vm622_vm0, %v591_v18  ;;  %v2609_v18 = vld [vmem:[%s7502_s4 + $0x10] sm:$0xff]  ;;  %5807 = vmatpush3.bf16.msra.mxu1 %v5804_v17  ;;  %v4511_v17 = vld [vmem:[%s6553_s22 + $0xb2] sm:$0xff] }
  0x57   : > { %5135 = vmatpush3.msra.mxu0 %v4389_v5  ;;  %5116 = vmatprep.mubr.msk.f32.mxu0 %vm622_vm0, %v592_v19  ;;  %v4439_v5 = vld [vmem:[%s6553_s22 + $0x1b0] sm:$0xff]  ;;  %v2610_v19 = vld [vmem:[%s7502_s4 + $0x18] sm:$0xff] }
  0x58   : > { %5157 = vmatprep.subr.mxu0 %v4418_v20 }
  0x5a   : > { %5117 = vmatmul.mubr.msk.f32.gmra.mrb[2].mxu0 %vm622_vm0, %v593_v21  ;;  %v5808_v21 = vpack.c.bf16 %v2610_v19, %v2609_v18  ;;  %v4512_v18 = vld [vmem:[%s6553_s22 + $0xba] sm:$0xff]  ;;  %v4513_v19 = vld [vmem:[%s6553_s22 + $0xc2] sm:$0xff] }
  0x5b   : > { %5119 = vmatprep.mubr.msk.f32.mxu0 %vm622_vm0, %v594_v22  ;;  %v2468_v22 = vld [vmem:[%s7501_s3 + $0x28] sm:$0xff] }
  0x5c   : > { %5809 = vmatprep.subr.bf16.mxu1 %v5808_v21  ;;  %2504 = vperm.xlu1 %6311, %v2468_v22   ;;  %v4516_v22 = vld [vmem:[%s6553_s22 + $0xda] sm:$0xff] }
  0x5d   : > { %5811 = vmatpush3.bf16.msra.mxu1 %v5808_v21  ;;  %v4515_v21 = vld [vmem:[%s6553_s22 + $0xd2] sm:$0xff] }
  0x5e   : > { %5120 = vmatmul.mubr.msk.f32.gmra.mrb[4].mxu0 %vm622_vm0, %v595_v23  ;;  %v4444_v23 = vld [vmem:[%s6553_s22 + $0x1d8] sm:$0xff] }
  0x5f   : > { %5122 = vmatprep.mubr.msk.f32.mxu0 %vm622_vm0, %v596_v24  ;;  %v2611_v24 = vld [vmem:[%s7502_s4 + $0x20] sm:$0xff] }
  0x62   : > { %5123 = vmatmul.mubr.msk.f32.gmra.mrb[6].mxu0 %vm622_vm0, %v597_v25  ;;  %v2612_v25 = vld [vmem:[%s7502_s4 + $0x28] sm:$0xff] }
  0x63   : > { %5125 = vmatprep.mubr.msk.f32.mxu0 %vm622_vm0, %v598_v26  ;;  %v4445_v26 = vld [vmem:[%s6553_s22 + $0x1e0] sm:$0xff] }
  0x66   : > { %5126 = vmatmul.mubr.msk.f32.gmra.mrb[8].mxu0 %vm622_vm0, %v599_v27  ;;  %v5812_v27 = vpack.c.bf16 %v2612_v25, %v2611_v24  ;;  %v4518_v24 = vld [vmem:[%s6553_s22 + $0xea] sm:$0xff]  ;;  %v4519_v25 = vld [vmem:[%s6553_s22 + $0xf2] sm:$0xff] }
  0x67   : > { %5128 = vmatprep.mubr.msk.f32.mxu0 %vm622_vm0, %v600_v28  ;;  %v2469_v28 = vld [vmem:[%s7501_s3 + $0x30] sm:$0xff] }
  0x68   : > { %5813 = vmatprep.subr.bf16.mxu1 %v5812_v27 }
  0x69   : > { %5815 = vmatpush3.bf16.msra.mxu1 %v5812_v27  ;;  %v4553_v27 = vld [vmem:[%s7502_s4 + $0x90] sm:$0xff] }
  0x6a   : > { %5129 = vmatmul.mubr.msk.f32.gmra.mrb[10].mxu0 %vm622_vm0, %v601_v29  ;;  %v2470_v29 = vld [vmem:[%s7501_s3 + $0x38] sm:$0xff] }
  0x6b   : > { %5131 = vmatprep.mubr.msk.f32.mxu0 %vm622_vm0, %v602_v30  ;;  %v4446_v30 = vld [vmem:[%s6553_s22 + $0x1e8] sm:$0xff]  ;;  %2514 = vperm.xlu1 %6311, %v2470_v29   ;;  %v2222_v29 = vld [vmem:[%s6553_s22 + $0x13] sm:$0xff] }
  0x6e   : > { %5132 = vmatmul.mubr.msk.f32.gmra.mrb[12].mxu0 %vm622_vm0, %v603_v31  ;;  %v2613_v31 = vld [vmem:[%s7502_s4 + $0x30] sm:$0xff] }
  0x6f   : > { %5136 = vmatprep.mubr.msk.f32.mxu0 %vm622_vm0, %v977_v32  ;;  %v2614_v32 = vld [vmem:[%s7502_s4 + $0x38] sm:$0xff] }
  0x72   : > { %5137 = vmatmul.mubr.msk.f32.vlgmr.msra.gmra.mrb[0].mxu0 %vm622_vm0, %v978_v33  ;;  %v4462_v33 = vld [vmem:[%s6553_s22 + $0x101] sm:$0xff] }
  0x73   : > { %5158 = vmatpush3.msra.mxu0 %v4418_v20  ;;  %5139 = vmatprep.mubr.msk.f32.mxu0 %vm622_vm0, %v979_v34  ;;  %v2467_v20 = vld [vmem:[%s7501_s3 + $0x20] sm:$0xff]  ;;  %v5816_v34 = vpack.c.bf16 %v2614_v32, %v2613_v31 }
  0x74   : > { %5180 = vmatprep.subr.mxu0 %v4447_v35  ;;  %2499 = vperm.xlu0 %6310, %v2467_v20   ;;  %v4514_v20 = vld [vmem:[%s6553_s22 + $0xca] sm:$0xff] }
  0x75   : > { %5817 = vmatprep.subr.bf16.mxu1 %v5816_v34  ;;  %v4555_v32 = vld [vmem:[%s7502_s4 + $0xa0] sm:$0xff] }
  0x76   : > { %5140 = vmatmul.mubr.msk.f32.gmra.mrb[2].mxu0 %vm622_vm0, %v980_v36  ;;  %v2472_v36 = vld [vmem:[%s7501_s3 + $0x48] sm:$0xff]  ;;  %5819 = vmatpush3.bf16.msra.mxu1 %v5816_v34  ;;  %v2224_v34 = vld [vmem:[%s6553_s22 + $0x23] sm:$0xff] }
  0x77   : > { %5142 = vmatprep.mubr.msk.f32.mxu0 %vm622_vm0, %v981_v37  ;;  %v4463_v37 = vld [vmem:[%s6553_s22 + $0x109] sm:$0xff]  ;;  %2524 = vperm.xlu1 %6311, %v2472_v36  }
  0x78   : > { %2509 = vperm.xlu0 %6310, %v2469_v28   ;;  %v4554_v28 = vld [vmem:[%s7502_s4 + $0x98] sm:$0xff] }
  0x79   : > { %v5776_v31 = vpack.c.bf16 %v4554_v28, %v4553_v27 }
  0x7a   : > { %5143 = vmatmul.mubr.msk.f32.gmra.mrb[4].mxu0 %vm622_vm0, %v982_v38  ;;  %v2615_v38 = vld [vmem:[%s7502_s4 + $0x40] sm:$0xff] }
  0x7b   : > { %5145 = vmatprep.mubr.msk.f32.mxu0 %vm622_vm0, %v983_v39  ;;  %v2616_v39 = vld [vmem:[%s7502_s4 + $0x48] sm:$0xff] }
  0x7e   : > { %5146 = vmatmul.mubr.msk.f32.gmra.mrb[6].mxu0 %vm622_vm0, %v984_v40  ;;  %v4464_v40 = vld [vmem:[%s6553_s22 + $0x111] sm:$0xff] }
  0x7f   : > { %5148 = vmatprep.mubr.msk.f32.mxu0 %vm622_vm0, %v985_v41  ;;  %v4520_v41 = vld [vmem:[%s7499_s1 + $0x38] sm:$0xff] }
  0x82   : > { %5149 = vmatmul.mubr.msk.f32.gmra.mrb[8].mxu0 %vm622_vm0, %v986_v42  ;;  %v2473_v42 = vld [vmem:[%s7501_s3 + $0x50] sm:$0xff] }
  0x83   : > { %5151 = vmatprep.mubr.msk.f32.mxu0 %vm622_vm0, %v987_v43  ;;  %v2474_v43 = vld [vmem:[%s7501_s3 + $0x58] sm:$0xff] }
  0x84   : > { %2534 = vperm.xlu1 %6311, %v2474_v43   ;;  %v2229_v43 = vld [vmem:[%s6553_s22 + $0x4b] sm:$0xff] }
  0x86   : > { %5152 = vmatmul.mubr.msk.f32.gmra.mrb[10].mxu0 %vm622_vm0, %v988_v44  ;;  %v5820_v44 = vpack.c.bf16 %v2616_v39, %v2615_v38  ;;  %v4558_v38 = vld [vmem:[%s7502_s4 + $0xb8] sm:$0xff]  ;;  %v2226_v39 = vld [vmem:[%s6553_s22 + $0x33] sm:$0xff] }
  0x87   : > { %5154 = vmatprep.mubr.msk.f32.mxu0 %vm622_vm0, %v989_v45  ;;  %v4465_v45 = vld [vmem:[%s6553_s22 + $0x119] sm:$0xff] }
  0x88   : > { %5821 = vmatprep.subr.bf16.mxu1 %v5820_v44 }
  0x89   : > { %5823 = vmatpush3.bf16.msra.mxu1 %v5820_v44  ;;  %v2230_v44 = vld [vmem:[%s6553_s22 + $0x53] sm:$0xff] }
  0x8a   : > { %5155 = vmatmul.mubr.msk.f32.gmra.mrb[12].mxu0 %vm622_vm0, %v990_v46  ;;  %v4466_v46 = vld [vmem:[%s6553_s22 + $0x121] sm:$0xff] }
  0x8b   : > { %5159 = vmatprep.mubr.msk.f32.mxu0 %vm622_vm0, %v4404_v47  ;;  %v2475_v47 = vld [vmem:[%s7501_s3 + $0x60] sm:$0xff] }
  0x8e   : > { %5160 = vmatmul.mubr.msk.f32.vlgmr.msra.gmra.mrb[0].mxu0 %vm622_vm0, %v4405_v48  ;;  %v2476_v48 = vld [vmem:[%s7501_s3 + $0x68] sm:$0xff] }
  0x8f   : > { %5181 = vmatpush3.msra.mxu0 %v4447_v35  ;;  %5162 = vmatprep.mubr.msk.f32.mxu0 %vm622_vm0, %v4406_v49  ;;  %v2471_v35 = vld [vmem:[%s7501_s3 + $0x40] sm:$0xff] }
  0x90   : > { %5203 = vmatprep.subr.mxu0 %v4476_v50  ;;  %2519 = vperm.xlu0 %6310, %v2471_v35   ;;  %v4467_v49 = vld [vmem:[%s6553_s22 + $0x129] sm:$0xff] }
  0x91   : > { %2544 = vperm.xlu1 %6311, %v2476_v48   ;;  %v2225_v35 = vld [vmem:[%s6553_s22 + $0x2b] sm:$0xff]  ;;  %v2234_v48 = vld [vmem:[%s6553_s22 + $0x73] sm:$0xff] }
  0x92   : > { %5163 = vmatmul.mubr.msk.f32.gmra.mrb[2].mxu0 %vm622_vm0, %v4407_v51  ;;  %v4469_v51 = vld [vmem:[%s6553_s22 + $0x139] sm:$0xff] }
  0x93   : > { %5165 = vmatprep.mubr.msk.f32.mxu0 %vm622_vm0, %v4408_v52  ;;  %v4470_v52 = vld [vmem:[%s6553_s22 + $0x141] sm:$0xff] }
  0x94   : > { %2529 = vperm.xlu0 %6310, %v2473_v42   ;;  %v2228_v42 = vld [vmem:[%s6553_s22 + $0x43] sm:$0xff] }
  0x96   : > { %5166 = vmatmul.mubr.msk.f32.gmra.mrb[4].mxu0 %vm622_vm0, %v4409_v53  ;;  %v4471_v53 = vld [vmem:[%s6553_s22 + $0x149] sm:$0xff] }
  0x97   : > { %5168 = vmatprep.mubr.msk.f32.mxu0 %vm622_vm0, %v4410_v54  ;;  %v4472_v54 = vld [vmem:[%s6553_s22 + $0x151] sm:$0xff] }
  0x98   : > { %2539 = vperm.xlu0 %6310, %v2475_v47   ;;  %v2233_v47 = vld [vmem:[%s6553_s22 + $0x6b] sm:$0xff] }
  0x9a   : > { %5169 = vmatmul.mubr.msk.f32.gmra.mrb[6].mxu0 %vm622_vm0, %v4411_v55  ;;  %v4473_v55 = vld [vmem:[%s6553_s22 + $0x159] sm:$0xff] }
  0x9b   : > { %5171 = vmatprep.mubr.msk.f32.mxu0 %vm622_vm0, %v4412_v56  ;;  %v4474_v56 = vld [vmem:[%s6553_s22 + $0x161] sm:$0xff] }
  0x9e   : > { %5172 = vmatmul.mubr.msk.f32.gmra.mrb[8].mxu0 %vm622_vm0, %v4413_v57  ;;  %v4475_v57 = vld [vmem:[%s6553_s22 + $0x169] sm:$0xff] }
  0x9f   : > { %5174 = vmatprep.mubr.msk.f32.mxu0 %vm622_vm0, %v4414_v58  ;;  %v1807_v58 = vld [vmem:[%s6553_s22 + $0xa] sm:$0xff] }
  0xa2   : > { %5175 = vmatmul.mubr.msk.f32.gmra.mrb[10].mxu0 %vm622_vm0, %v4415_v59  ;;  %v1808_v59 = vld [vmem:[%s6553_s22 + $0x12] sm:$0xff] }
  0xa3   : > { %5177 = vmatprep.mubr.msk.f32.mxu0 %vm622_vm0, %v4416_v60  ;;  %v1809_v60 = vld [vmem:[%s6553_s22 + $0x1a] sm:$0xff] }
  0xa6   : > { %5178 = vmatmul.mubr.msk.f32.gmra.mrb[12].mxu0 %vm622_vm0, %v4417_v61  ;;  %v4535_v61 = vld [vmem:[%s7499_s1 + $0x40] sm:$0xff] }
  0xa7   : > { %5182 = vmatprep.mubr.msk.f32.mxu0 %vm622_vm0, %v4433_v62  ;;  %v1810_v62 = vld [vmem:[%s6553_s22 + $0x22] sm:$0xff] }
  0xaa   : > { %5183 = vmatmul.mubr.msk.f32.vlgmr.msra.gmra.mrb[0].mxu0 %vm622_vm0, %v4434_v63  ;;  %v1811_v63 = vld [vmem:[%s6553_s22 + $0x2a] sm:$0xff] }
  0xab   : > { %5204 = vmatpush3.msra.mxu0 %v4476_v50  ;;  %5185 = vmatprep.mubr.msk.f32.mxu0 %vm622_vm0, %v4435_v0  ;;  %v4468_v50 = vld [vmem:[%s6553_s22 + $0x131] sm:$0xff] }
  0xac   : > { %5226 = vmatprep.subr.mxu0 %v6686_v1  ;;  %v1812_v0 = vld [vmem:[%s6553_s22 + $0x32] sm:$0xff] }
  0xae   : > { %5186 = vmatmul.mubr.msk.f32.gmra.mrb[2].mxu0 %vm622_vm0, %v4436_v2  ;;  %v1814_v2 = vld [vmem:[%s6553_s22 + $0x42] sm:$0xff] }
  0xaf   : > { %5188 = vmatprep.mubr.msk.f32.mxu0 %vm622_vm0, %v4437_v3  ;;  %v1815_v3 = vld [vmem:[%s6553_s22 + $0x4a] sm:$0xff] }
  0xb2   : > { %5189 = vmatmul.mubr.msk.f32.gmra.mrb[4].mxu0 %vm622_vm0, %v4438_v4  ;;  %v1816_v4 = vld [vmem:[%s6553_s22 + $0x52] sm:$0xff] }
  0xb3   : > { %5191 = vmatprep.mubr.msk.f32.mxu0 %vm622_vm0, %v4439_v5  ;;  %v1817_v5 = vld [vmem:[%s6553_s22 + $0x5a] sm:$0xff] }
  0xb6   : > { %5192 = vmatmul.mubr.msk.f32.gmra.mrb[6].mxu0 %vm622_vm0, %v4440_v8  ;;  %v1820_v8 = vld [vmem:[%s6553_s22 + $0x72] sm:$0xff] }
  0xb7   : > { %5194 = vmatprep.mubr.msk.f32.mxu0 %vm622_vm0, %v4441_v10  ;;  %v4551_v10 = vld [vmem:[%s7502_s4 + $0x80] sm:$0xff] }
  0xba   : > { %5195 = vmatmul.mubr.msk.f32.gmra.mrb[8].mxu0 %vm622_vm0, %v4442_v14  ;;  %v5772_v14 = vpack.c.bf16 %v4552_v11, %v4551_v10 }
  0xbb   : > { %5197 = vmatprep.mubr.msk.f32.mxu0 %vm622_vm0, %v4443_v16  ;;  %v4510_v16 = vld [vmem:[%s6553_s22 + $0xaa] sm:$0xff] }
  0xbe   : > { %5198 = vmatmul.mubr.msk.f32.gmra.mrb[10].mxu0 %vm622_vm0, %v4444_v23  ;;  %v4517_v23 = vld [vmem:[%s6553_s22 + $0xe2] sm:$0xff] }
  0xbf   : > { %5200 = vmatprep.mubr.msk.f32.mxu0 %vm622_vm0, %v4445_v26  ;;  %v2221_v26 = vld [vmem:[%s6553_s22 + $0xb] sm:$0xff] }
  0xc2   : > { %5201 = vmatmul.mubr.msk.f32.gmra.mrb[12].mxu0 %vm622_vm0, %v4446_v30  ;;  %v2223_v30 = vld [vmem:[%s6553_s22 + $0x1b] sm:$0xff] }
  0xc3   : > { %5205 = vmatprep.mubr.msk.f32.mxu0 %vm622_vm0, %v4462_v33  ;;  %v4556_v33 = vld [vmem:[%s7502_s4 + $0xa8] sm:$0xff] }
  0xc4   : > { %v5780_v36 = vpack.c.bf16 %v4556_v33, %v4555_v32 }
  0xc6   : > { %5206 = vmatmul.mubr.msk.f32.vlgmr.msra.gmra.mrb[0].mxu0 %vm622_vm0, %v4463_v37  ;;  %v4557_v37 = vld [vmem:[%s7502_s4 + $0xb0] sm:$0xff] }
  0xc7   : > { %5227 = vmatpush3.msra.mxu0 %v6686_v1  ;;  %5208 = vmatprep.mubr.msk.f32.mxu0 %vm622_vm0, %v4464_v40  ;;  %v1813_v1 = vld [vmem:[%s6553_s22 + $0x3a] sm:$0xff] }
  0xc8   : > { %5249 = vmatprep.subr.mxu0 %v4520_v41  ;;  %v2227_v40 = vld [vmem:[%s6553_s22 + $0x3b] sm:$0xff] }
  0xca   : > { %5209 = vmatmul.mubr.msk.f32.gmra.mrb[2].mxu0 %vm622_vm0, %v4465_v45  ;;  %v2231_v45 = vld [vmem:[%s6553_s22 + $0x5b] sm:$0xff] }
  0xcb   : > { %5211 = vmatprep.mubr.msk.f32.mxu0 %vm622_vm0, %v4466_v46  ;;  %v2232_v46 = vld [vmem:[%s6553_s22 + $0x63] sm:$0xff] }
  0xce   : > { %5212 = vmatmul.mubr.msk.f32.gmra.mrb[4].mxu0 %vm622_vm0, %v4467_v49  ;;  %v4559_v49 = vld [vmem:[%s7502_s4 + $0xc0] sm:$0xff] }
  0xcf   : > { %5214 = vmatprep.mubr.msk.f32.mxu0 %vm622_vm0, %v4468_v50  ;;  %v4560_v50 = vld [vmem:[%s7502_s4 + $0xc8] sm:$0xff] }
  0xd2   : > { %5215 = vmatmul.mubr.msk.f32.gmra.mrb[6].mxu0 %vm622_vm0, %v4469_v51  ;;  %v5788_v51 = vpack.c.bf16 %v4560_v50, %v4559_v49 }
  0xd3   : > { %5217 = vmatprep.mubr.msk.f32.mxu0 %vm622_vm0, %v4470_v52  ;;  %v2617_v52 = vld [vmem:[%s7502_s4 + $0x50] sm:$0xff] }
  0xd6   : > { %5218 = vmatmul.mubr.msk.f32.gmra.mrb[8].mxu0 %vm622_vm0, %v4471_v53  ;;  %v2618_v53 = vld [vmem:[%s7502_s4 + $0x58] sm:$0xff] }
  0xd7   : > { %5220 = vmatprep.mubr.msk.f32.mxu0 %vm622_vm0, %v4472_v54  ;;  %v5824_v54 = vpack.c.bf16 %v2618_v53, %v2617_v52  ;;  %v4571_v52 = vld [vmem:[%s7502_s4 + $0x120] sm:$0xff]  ;;  %v4572_v53 = vld [vmem:[%s7502_s4 + $0x128] sm:$0xff] }
  0xd9   : > { %5825 = vmatprep.subr.bf16.mxu1 %v5824_v54 }
  0xda   : > { %5221 = vmatmul.mubr.msk.f32.gmra.mrb[10].mxu0 %vm622_vm0, %v4473_v55  ;;  %v4561_v55 = vld [vmem:[%s7502_s4 + $0xd0] sm:$0xff]  ;;  %5827 = vmatpush3.bf16.msra.mxu1 %v5824_v54 }
  0xdb   : > { %5223 = vmatprep.mubr.msk.f32.mxu0 %vm622_vm0, %v4474_v56  ;;  %v4562_v56 = vld [vmem:[%s7502_s4 + $0xd8] sm:$0xff] }
  0xde   : > { %5224 = vmatmul.mubr.msk.f32.gmra.mrb[12].mxu0 %vm622_vm0, %v4475_v57  ;;  %v5792_v57 = vpack.c.bf16 %v4562_v56, %v4561_v55 }
  0xdf   : > { %5228 = vmatprep.mubr.msk.f32.mxu0 %vm622_vm0, %v1807_v58  ;;  %v2619_v58 = vld [vmem:[%s7502_s4 + $0x60] sm:$0xff] }
  0xe2   : > { %5229 = vmatmul.mubr.msk.f32.vlgmr.msra.gmra.mrb[0].mxu0 %vm622_vm0, %v1808_v59  ;;  %v2620_v59 = vld [vmem:[%s7502_s4 + $0x68] sm:$0xff] }
  0xe3   : > { %5250 = vmatpush3.msra.mxu0 %v4520_v41  ;;  %5231 = vmatprep.mubr.msk.f32.mxu0 %vm622_vm0, %v1809_v60  ;;  %v5784_v41 = vpack.c.bf16 %v4558_v38, %v4557_v37  ;;  %v5828_v60 = vpack.c.bf16 %v2620_v59, %v2619_v58 }
  0xe4   : > { %5272 = vmatprep.subr.mxu0 %v4535_v61 }
  0xe5   : > { %5829 = vmatprep.subr.bf16.mxu1 %v5828_v60 }
  0xe6   : > { %5232 = vmatmul.mubr.msk.f32.gmra.mrb[2].mxu0 %vm622_vm0, %v1810_v62  ;;  %v4564_v62 = vld [vmem:[%s7502_s4 + $0xe8] sm:$0xff]  ;;  %5831 = vmatpush3.bf16.msra.mxu1 %v5828_v60 }
  0xe7   : > { %5234 = vmatprep.mubr.msk.f32.mxu0 %vm622_vm0, %v1811_v63  ;;  %v6337_v63 = vmov 0.0  }
  0xe8   : > { %2561 = vst [vmem:[#allocation2] sm:$0xff] %v6337_v63  ;;  %2562 = vst [vmem:[#allocation2 + $0x8] sm:$0xff] %v6337_v63 }
  0xe9   : > { %2577 = vst [vmem:[#allocation2 + $0x80] sm:$0xff] %v6337_v63  ;;  %2578 = vst [vmem:[#allocation2 + $0x88] sm:$0xff] %v6337_v63 }
  0xea   : > { %5235 = vmatmul.mubr.msk.f32.gmra.mrb[4].mxu0 %vm622_vm0, %v1812_v0 }
  0xeb   : > { %5237 = vmatprep.mubr.msk.f32.mxu0 %vm622_vm0, %v1813_v1  ;;  %v2621_v1 = vld [vmem:[%s7502_s4 + $0x70] sm:$0xff] }
  0xee   : > { %5238 = vmatmul.mubr.msk.f32.gmra.mrb[6].mxu0 %vm622_vm0, %v1814_v2  ;;  %v2622_v2 = vld [vmem:[%s7502_s4 + $0x78] sm:$0xff] }
  0xef   : > { %5240 = vmatprep.mubr.msk.f32.mxu0 %vm622_vm0, %v1815_v3  ;;  %v5832_v3 = vpack.c.bf16 %v2622_v2, %v2621_v1  ;;  %v2623_v10 = vld [vmem:[#allocation2 + $0x6] sm:$0xff] }
  0xf0   : > { %v2593_v11 = vld [vmem:[#allocation2 + $0x5] sm:$0xff] }
  0xf1   : > { %5833 = vmatprep.subr.bf16.mxu1 %v5832_v3  ;;  %5380 = vmatprep.mubr.f32.mxu1 %v2593_v11 }
  0xf2   : > { %5241 = vmatmul.mubr.msk.f32.gmra.mrb[8].mxu0 %vm622_vm0, %v1816_v4  ;;  %v4565_v4 = vld [vmem:[%s7502_s4 + $0xf0] sm:$0xff]  ;;  %5835 = vmatpush3.bf16.msra.mxu1 %v5832_v3 }
  0xf3   : > { %5243 = vmatprep.mubr.msk.f32.mxu0 %vm622_vm0, %v1817_v5  ;;  %v4566_v5 = vld [vmem:[%s7502_s4 + $0xf8] sm:$0xff] }
  0xf6   : > { %5244 = vmatmul.mubr.msk.f32.gmra.mrb[10].mxu0 %vm622_vm0, %v1818_v6  ;;  %v5800_v6 = vpack.c.bf16 %v4566_v5, %v4565_v4  ;;  %v5844_v4 = vpack.c.bf16 %v4572_v53, %v4571_v52  ;;  %v4573_v5 = vld [vmem:[%s7502_s4 + $0x130] sm:$0xff] }
  0xf7   : > { %5246 = vmatprep.mubr.msk.f32.mxu0 %vm622_vm0, %v1819_v7  ;;  %v4567_v7 = vld [vmem:[%s7502_s4 + $0x100] sm:$0xff] }
  0xfa   : > { %5247 = vmatmul.mubr.msk.f32.gmra.mrb[12].mxu0 %vm622_vm0, %v1820_v8  ;;  %v4568_v8 = vld [vmem:[%s7502_s4 + $0x108] sm:$0xff] }
  0xfb   : > { %5251 = vmatprep.mubr.msk.f32.mxu0 %vm622_vm0, %v4506_v9  ;;  %v6976_v9 = vpack.c.bf16 %v4568_v8, %v4567_v7 }
  0xfd   : > { %5837 = vmatprep.subr.bf16.mxu1 %v6976_v9 }
  0xfe   : > { %5252 = vmatmul.mubr.msk.f32.vlgmr.msra.gmra.mrb[0].mxu0 %vm622_vm0, %v4507_v12  ;;  %v2490_v12 = vpop.permute.xlu1 %2489 }
  0xff   : > { %5273 = vmatpush3.msra.mxu0 %v4535_v61  ;;  %5254 = vmatprep.mubr.msk.f32.mxu0 %vm622_vm0, %v4508_v13  ;;  %v4563_v61 = vld [vmem:[%s7502_s4 + $0xe0] sm:$0xff]  ;;  %v2480_v13 = vpop.permute.xlu0 %2479 }
 0x100   : > { %5773 = vmatprep.subr.bf16.mxu0 %v5772_v14  ;;  %v5796_v0 = vpack.c.bf16 %v4564_v62, %v4563_v61 }
 0x102   : > { %5255 = vmatmul.mubr.msk.f32.gmra.mrb[2].mxu0 %vm622_vm0, %v4509_v15  ;;  %v6982_v15 = vld [vmem:[%s7500_s2] ss:$0 sm:$0xff] }
 0x103   : > { %5257 = vmatprep.mubr.msk.f32.mxu0 %vm622_vm0, %v4510_v16  ;;  %v2485_v16 = vpop.permute.xlu0 %2484 }
 0x106   : > { %5258 = vmatmul.mubr.msk.f32.gmra.mrb[4].mxu0 %vm622_vm0, %v4511_v17 }
 0x107   : > { %5260 = vmatprep.mubr.msk.f32.mxu0 %vm622_vm0, %v4512_v18 }
 0x10a   : > { %5261 = vmatmul.mubr.msk.f32.gmra.mrb[6].mxu0 %vm622_vm0, %v4513_v19 }
 0x10b   : > { %5263 = vmatprep.mubr.msk.f32.mxu0 %vm622_vm0, %v4514_v20 }
 0x10e   : > { %5264 = vmatmul.mubr.msk.f32.gmra.mrb[8].mxu0 %vm622_vm0, %v4515_v21 }
 0x10f   : > { %5266 = vmatprep.mubr.msk.f32.mxu0 %vm622_vm0, %v4516_v22 }
 0x112   : > { %5267 = vmatmul.mubr.msk.f32.gmra.mrb[10].mxu0 %vm622_vm0, %v4517_v23 }
 0x113   : > { %5269 = vmatprep.mubr.msk.f32.mxu0 %vm622_vm0, %v4518_v24 }
 0x116   : > { %5270 = vmatmul.mubr.msk.f32.gmra.mrb[12].mxu0 %vm622_vm0, %v4519_v25  ;;  %v2500_v25 = vpop.permute.xlu0 %2499 }
 0x117   : > { %5274 = vmatprep.mubr.msk.f32.mxu0 %vm622_vm0, %v2221_v26 }
 0x11a   : > { %5275 = vmatmul.mubr.msk.f32.vlgmr.msra.gmra.mrb[0].mxu0 %vm622_vm0, %v2222_v29 }
 0x11b   : > { %5277 = vmatprep.mubr.msk.f32.mxu0 %vm622_vm0, %v2223_v30  ;;  %5775 = vmatpush3.bf16.msra.mxu0 %v5772_v14  ;;  %v2495_v14 = vpop.permute.xlu1 %2494 }
 0x11c   : > { %5777 = vmatprep.subr.bf16.mxu0 %v5776_v31 }
 0x11e   : > { %5278 = vmatmul.mubr.msk.f32.gmra.mrb[2].mxu0 %vm622_vm0, %v2224_v34 }
 0x11f   : > { %5280 = vmatprep.mubr.msk.f32.mxu0 %vm622_vm0, %v2225_v35  ;;  %5779 = vmatpush3.bf16.msra.mxu0 %v5776_v31  ;;  %v2505_v22 = vpop.permute.xlu1 %2504 }
 0x120   : > { %5781 = vmatprep.subr.bf16.mxu0 %v5780_v36 }
 0x122   : > { %5281 = vmatmul.mubr.msk.f32.gmra.mrb[4].mxu0 %vm622_vm0, %v2226_v39 }
 0x123   : > { %5283 = vmatprep.mubr.msk.f32.mxu0 %vm622_vm0, %v2227_v40  ;;  %5783 = vmatpush3.bf16.msra.mxu0 %v5780_v36  ;;  %v2515_v37 = vpop.permute.xlu1 %2514  ;;  %v2510_v40 = vpop.permute.xlu0 %2509 }
 0x124   : > { %5785 = vmatprep.subr.bf16.mxu0 %v5784_v41 }
 0x126   : > { %5284 = vmatmul.mubr.msk.f32.gmra.mrb[6].mxu0 %vm622_vm0, %v2228_v42  ;;  %v4569_v42 = vld [vmem:[%s7502_s4 + $0x110] sm:$0xff] }
 0x127   : > { %5286 = vmatprep.mubr.msk.f32.mxu0 %vm622_vm0, %v2229_v43  ;;  %5787 = vmatpush3.bf16.msra.mxu0 %v5784_v41  ;;  %v4570_v43 = vld [vmem:[%s7502_s4 + $0x118] sm:$0xff]  ;;  %v2525_v58 = vpop.permute.xlu1 %2524  ;;  %v2520_v62 = vpop.permute.xlu0 %2519 }
 0x128   : > { %5789 = vmatprep.subr.bf16.mxu0 %v5788_v51 }
 0x12a   : > { %5287 = vmatmul.mubr.msk.f32.gmra.mrb[8].mxu0 %vm622_vm0, %v2230_v44 }
 0x12b   : > { %5289 = vmatprep.mubr.msk.f32.mxu0 %vm622_vm0, %v2231_v45  ;;  %5791 = vmatpush3.bf16.msra.mxu0 %v5788_v51  ;;  %v5840_v51 = vpack.c.bf16 %v4570_v43, %v4569_v42  ;;  %v4577_v42 = vld [vmem:[%s7502_s4 + $0x150] sm:$0xff]  ;;  %v4578_v43 = vld [vmem:[%s7502_s4 + $0x158] sm:$0xff] }
 0x12c   : > { %5793 = vmatprep.subr.bf16.mxu0 %v5792_v57 }
 0x12e   : > { %5290 = vmatmul.mubr.msk.f32.gmra.mrb[10].mxu0 %vm622_vm0, %v2232_v46 }
 0x12f   : > { %5292 = vmatprep.mubr.msk.f32.mxu0 %vm622_vm0, %v2233_v47  ;;  %5795 = vmatpush3.bf16.msra.mxu0 %v5792_v57 }
 0x130   : > { %5797 = vmatprep.subr.bf16.mxu0 %v5796_v0 }
 0x132   : > { %5293 = vmatmul.mubr.msk.f32.gmra.mrb[12].mxu0 %vm622_vm0, %v2234_v48 }
 0x133   : > { %5799 = vmatpush3.bf16.msra.mxu0 %v5796_v0  ;;  %5327 = vmatprep.mubr.f32.mxu0 %v2623_v10 }
 0x134   : > { %5801 = vmatprep.subr.bf16.mxu0 %v5800_v6 }
 0x137   : > { %5803 = vmatpush3.bf16.msra.mxu0 %v5800_v6  ;;  %v4574_v6 = vld [vmem:[%s7502_s4 + $0x138] sm:$0xff] }
 0x1ed   : > { %v5276_v17 = vpop.f32.mrb[0].mxu0 }
 0x1ee   : > { %v2436_v18 = vadd.f32 %v5276_v17, %v6982_v15  ;;  %v2345_v19 = vpop.f32.mrb[1].mxu0 }
 0x1ef   : > { %v2435_v20 = vadd.f32 %v6982_v15, %v2345_v19 }
 0x1f0   : > { %v2450_v21 = vmax.f32 %v2436_v18, 0.0  ;;  %v2535_v18 = vpop.permute.xlu1 %2534 }
 0x1f1   : > { %v2449_v23 = vmax.f32 %v2435_v20, 0.0  ;;  %v5279_v24 = vpop.f32.mrb[2].mxu0 }
 0x1f2   : > { %v6986_v26 = vmul.f32 %v2485_v16, %v2450_v21  ;;  %v2438_v27 = vadd.f32 %v5279_v24, %v6982_v15  ;;  %v2355_v28 = vpop.f32.mrb[3].mxu0  ;;  %v5848_v21 = vpack.c.bf16 %v4574_v6, %v4573_v5  ;;  %v2530_v24 = vpop.permute.xlu0 %2529 }
 0x1f3   : > { %v6989_v29 = vmul.f32 %v2480_v13, %v2449_v23  ;;  %v2437_v30 = vadd.f32 %v6982_v15, %v2355_v28  ;;  %v4576_v23 = vld [vmem:[%s7502_s4 + $0x148] sm:$0xff] }
 0x1f4   : > { %2580 = vst [vmem:[#allocation2 + $0x18] sm:$0xff] %v6986_v26  ;;  %v2452_v31 = vmax.f32 %v2438_v27, 0.0 }
 0x1f5   : > { %2579 = vst [vmem:[#allocation2 + $0x10] sm:$0xff] %v6989_v29  ;;  %v2451_v32 = vmax.f32 %v2437_v30, 0.0  ;;  %v5282_v33 = vpop.f32.mrb[4].mxu0 }
 0x1f6   : > { %v6994_v34 = vmul.f32 %v2495_v14, %v2452_v31  ;;  %v2440_v35 = vadd.f32 %v5282_v33, %v6982_v15  ;;  %v2365_v36 = vpop.f32.mrb[5].mxu0  ;;  %v2540_v52 = vpop.permute.xlu0 %2539 }
 0x1f7   : > { %v6997_v38 = vmul.f32 %v2490_v12, %v2451_v32  ;;  %v2439_v39 = vadd.f32 %v6982_v15, %v2365_v36 }
 0x1f8   : > { %2582 = vst [vmem:[#allocation2 + $0x28] sm:$0xff] %v6994_v34  ;;  %v2454_v41 = vmax.f32 %v2440_v35, 0.0 }
 0x1f9   : > { %2581 = vst [vmem:[#allocation2 + $0x20] sm:$0xff] %v6997_v38  ;;  %v2453_v44 = vmax.f32 %v2439_v39, 0.0  ;;  %v5285_v45 = vpop.f32.mrb[6].mxu0 }
 0x1fa   : > { %v7008_v46 = vmul.f32 %v2505_v22, %v2454_v41  ;;  %v2442_v47 = vadd.f32 %v5285_v45, %v6982_v15  ;;  %v2375_v48 = vpop.f32.mrb[7].mxu0  ;;  %v4575_v22 = vld [vmem:[%s7502_s4 + $0x140] sm:$0xff] }
 0x1fb   : > { %v7011_v49 = vmul.f32 %v2500_v25, %v2453_v44  ;;  %v2441_v50 = vadd.f32 %v6982_v15, %v2375_v48  ;;  %v5852_v41 = vpack.c.bf16 %v4576_v23, %v4575_v22  ;;  %v4588_v22 = vld [vmem:[%s7502_s4 + $0x1a8] sm:$0xff] }
 0x1fc   : > { %2584 = vst [vmem:[#allocation2 + $0x38] sm:$0xff] %v7008_v46  ;;  %v2456_v54 = vmax.f32 %v2442_v47, 0.0  ;;  %v2624_v55 = vld [vmem:[#allocation2 + $0xe] sm:$0xff]  ;;  %v2625_v57 = vld [vmem:[#allocation2 + $0x16] sm:$0xff] }
 0x1fd   : > { %v2594_v56 = vld [vmem:[#allocation2 + $0xd] sm:$0xff]  ;;  %2583 = vst [vmem:[#allocation2 + $0x30] sm:$0xff] %v7011_v49  ;;  %v2455_v59 = vmax.f32 %v2441_v50, 0.0  ;;  %v5288_v60 = vpop.f32.mrb[8].mxu0  ;;  %5328 = vmatmul.mubr.f32.vlgmr.msra.gmra.mrb[14].mxu0 %v2624_v55  ;;  %v2595_v61 = vld [vmem:[#allocation2 + $0x15] sm:$0xff]  ;;  %v2545_v50 = vpop.permute.xlu1 %2544  ;;  %v5856_v55 = vpack.c.bf16 %v4578_v43, %v4577_v42 }
 0x1fe   : > { %5381 = vmatmul.mubr.f32.vlgmr.msra.gmra.mrb[0].mxu1 %v2594_v56  ;;  %v7022_v63 = vmul.f32 %v2515_v37, %v2456_v54  ;;  %v2444_v0 = vadd.f32 %v5288_v60, %v6982_v15  ;;  %v2385_v1 = vpop.f32.mrb[9].mxu0  ;;  %5330 = vmatprep.mubr.f32.mxu0 %v2625_v57  ;;  %v4579_v56 = vld [vmem:[%s7502_s4 + $0x160] sm:$0xff]  ;;  %v4580_v57 = vld [vmem:[%s7502_s4 + $0x168] sm:$0xff]  ;;  %v7101_v23 = vld [vmem:[#allocation2 + $0x17] sm:$0xff] }
 0x1ff   : > { %5839 = vmatpush3.bf16.msra.mxu1 %v6976_v9  ;;  %v7026_v2 = vmul.f32 %v2510_v40, %v2455_v59  ;;  %v2443_v3 = vadd.f32 %v6982_v15, %v2385_v1  ;;  %5383 = vmatprep.mubr.f32.mxu1 %v2595_v61  ;;  %v4582_v1 = vld [vmem:[%s7502_s4 + $0x178] sm:$0xff]  ;;  %v4593_v42 = vld [vmem:[%s7502_s4 + $0x1d0] sm:$0xff] }
 0x200   : > { %5841 = vmatprep.subr.bf16.mxu1 %v5840_v51  ;;  %2586 = vst [vmem:[#allocation2 + $0x48] sm:$0xff] %v7022_v63  ;;  %v2458_v7 = vmax.f32 %v2444_v0, 0.0  ;;  %v2626_v8 = vld [vmem:[#allocation2 + $0x1e] sm:$0xff]  ;;  %v2627_v10 = vld [vmem:[#allocation2 + $0x26] sm:$0xff]  ;;  %v4581_v0 = vld [vmem:[%s7502_s4 + $0x170] sm:$0xff] }
 0x201   : > { %v2596_v9 = vld [vmem:[#allocation2 + $0x1d] sm:$0xff]  ;;  %2585 = vst [vmem:[#allocation2 + $0x40] sm:$0xff] %v7026_v2  ;;  %v2457_v11 = vmax.f32 %v2443_v3, 0.0  ;;  %v5291_v12 = vpop.f32.mrb[10].mxu0  ;;  %5331 = vmatmul.mubr.f32.gmra.mrb[16].mxu0 %v2626_v8  ;;  %v2597_v13 = vld [vmem:[#allocation2 + $0x25] sm:$0xff] }
 0x202   : > { %5384 = vmatmul.mubr.f32.gmra.mrb[2].mxu1 %v2596_v9  ;;  %v7037_v14 = vmul.f32 %v2525_v58, %v2458_v7  ;;  %v2446_v16 = vadd.f32 %v5291_v12, %v6982_v15  ;;  %v2395_v17 = vpop.f32.mrb[11].mxu0  ;;  %5333 = vmatprep.mubr.f32.mxu0 %v2627_v10  ;;  %v5864_v7 = vpack.c.bf16 %v4582_v1, %v4581_v0  ;;  %v2924_v8 = vld [vmem:[#allocation2 + $0x7] sm:$0xff]  ;;  %v4594_v43 = vld [vmem:[%s7502_s4 + $0x1d8] sm:$0xff]  ;;  %v4601_v0 = vld [vmem:[%s7502_s4 + $0x210] sm:$0xff] }
 0x203   : > { %5843 = vmatpush3.bf16.msra.mxu1 %v5840_v51  ;;  %v7040_v19 = vmul.f32 %v2520_v62, %v2457_v11  ;;  %v2445_v20 = vadd.f32 %v6982_v15, %v2395_v17  ;;  %5386 = vmatprep.mubr.f32.mxu1 %v2597_v13  ;;  %v5860_v62 = vpack.c.bf16 %v4580_v57, %v4579_v56  ;;  %v4583_v9 = vld [vmem:[%s7502_s4 + $0x180] sm:$0xff]  ;;  %v4584_v12 = vld [vmem:[%s7502_s4 + $0x188] sm:$0xff]  ;;  %v4586_v17 = vld [vmem:[%s7502_s4 + $0x198] sm:$0xff] }
 0x204   : > { %5845 = vmatprep.subr.bf16.mxu1 %v5844_v4  ;;  %2588 = vst [vmem:[#allocation2 + $0x58] sm:$0xff] %v7037_v14  ;;  %v2460_v25 = vmax.f32 %v2446_v16, 0.0  ;;  %v2628_v27 = vld [vmem:[#allocation2 + $0x2e] sm:$0xff]  ;;  %v2629_v30 = vld [vmem:[#allocation2 + $0x36] sm:$0xff]  ;;  %v5868_v13 = vpack.c.bf16 %v4584_v12, %v4583_v9 }
 0x205   : > { %v2598_v28 = vld [vmem:[#allocation2 + $0x2d] sm:$0xff]  ;;  %2587 = vst [vmem:[#allocation2 + $0x50] sm:$0xff] %v7040_v19  ;;  %v2459_v31 = vmax.f32 %v2445_v20, 0.0  ;;  %v5294_v32 = vpop.f32.mrb[12].mxu0  ;;  %5334 = vmatmul.mubr.f32.gmra.mrb[18].mxu0 %v2628_v27  ;;  %v2599_v33 = vld [vmem:[#allocation2 + $0x35] sm:$0xff] }
 0x206   : > { %5387 = vmatmul.mubr.f32.gmra.mrb[4].mxu1 %v2598_v28  ;;  %v7051_v35 = vmul.f32 %v2535_v18, %v2460_v25  ;;  %v2448_v36 = vadd.f32 %v5294_v32, %v6982_v15  ;;  %v2405_v37 = vpop.f32.mrb[13].mxu0  ;;  %5336 = vmatprep.mubr.f32.mxu0 %v2629_v30  ;;  %v4585_v16 = vld [vmem:[%s7502_s4 + $0x190] sm:$0xff]  ;;  %v2927_v25 = vld [vmem:[#allocation2 + $0x1f] sm:$0xff]  ;;  %v2928_v30 = vld [vmem:[#allocation2 + $0x27] sm:$0xff] }
 0x207   : > { %5847 = vmatpush3.bf16.msra.mxu1 %v5844_v4  ;;  %v7054_v39 = vmul.f32 %v2530_v24, %v2459_v31  ;;  %v2447_v40 = vadd.f32 %v6982_v15, %v2405_v37  ;;  %5389 = vmatprep.mubr.f32.mxu1 %v2599_v33  ;;  %v5872_v18 = vpack.c.bf16 %v4586_v17, %v4585_v16  ;;  %v2925_v20 = vld [vmem:[#allocation2 + $0xf] sm:$0xff]  ;;  %v4590_v28 = vld [vmem:[%s7502_s4 + $0x1b8] sm:$0xff]  ;;  %v4591_v33 = vld [vmem:[%s7502_s4 + $0x1c0] sm:$0xff] }
 0x208   : > { %5849 = vmatprep.subr.bf16.mxu1 %v5848_v21  ;;  %2590 = vst [vmem:[#allocation2 + $0x68] sm:$0xff] %v7051_v35  ;;  %v2462_v44 = vmax.f32 %v2448_v36, 0.0  ;;  %v2630_v45 = vld [vmem:[#allocation2 + $0x3e] sm:$0xff]  ;;  %v2631_v48 = vld [vmem:[#allocation2 + $0x46] sm:$0xff]  ;;  %v4589_v27 = vld [vmem:[%s7502_s4 + $0x1b0] sm:$0xff] }
 0x209   : > { %v2600_v47 = vld [vmem:[#allocation2 + $0x3d] sm:$0xff]  ;;  %2589 = vst [vmem:[#allocation2 + $0x60] sm:$0xff] %v7054_v39  ;;  %v2461_v15 = vmax.f32 %v2447_v40, 0.0  ;;  %5337 = vmatmul.mubr.f32.gmra.mrb[20].mxu0 %v2630_v45  ;;  %v2601_v51 = vld [vmem:[#allocation2 + $0x45] sm:$0xff]  ;;  %v5880_v31 = vpack.c.bf16 %v4590_v28, %v4589_v27  ;;  %v2929_v32 = vld [vmem:[#allocation2 + $0x2f] sm:$0xff]  ;;  %v5888_v45 = vpack.c.bf16 %v4594_v43, %v4593_v42 }
 0x20a   : > { %5390 = vmatmul.mubr.f32.gmra.mrb[6].mxu1 %v2600_v47  ;;  %v7065_v53 = vmul.f32 %v2545_v50, %v2462_v44  ;;  %5339 = vmatprep.mubr.f32.mxu0 %v2631_v48  ;;  %v4592_v36 = vld [vmem:[%s7502_s4 + $0x1c8] sm:$0xff]  ;;  %v2930_v37 = vld [vmem:[#allocation2 + $0x37] sm:$0xff]  ;;  %v4595_v48 = vld [vmem:[%s7502_s4 + $0x1e0] sm:$0xff] }
 0x20b   : > { %5851 = vmatpush3.bf16.msra.mxu1 %v5848_v21  ;;  %v7067_v54 = vmul.f32 %v2540_v52, %v2461_v15  ;;  %5392 = vmatprep.mubr.f32.mxu1 %v2601_v51  ;;  %v4587_v21 = vld [vmem:[%s7502_s4 + $0x1a0] sm:$0xff]  ;;  %v5884_v40 = vpack.c.bf16 %v4592_v36, %v4591_v33  ;;  %v4596_v50 = vld [vmem:[%s7502_s4 + $0x1e8] sm:$0xff]  ;;  %v4598_v56 = vld [vmem:[%s7502_s4 + $0x1f8] sm:$0xff] }
 0x20c   : > { %5853 = vmatprep.subr.bf16.mxu1 %v5852_v41  ;;  %2592 = vst [vmem:[#allocation2 + $0x78] sm:$0xff] %v7065_v53  ;;  %v2632_v58 = vld [vmem:[#allocation2 + $0x4e] sm:$0xff]  ;;  %v2633_v60 = vld [vmem:[#allocation2 + $0x56] sm:$0xff]  ;;  %v5876_v24 = vpack.c.bf16 %v4588_v22, %v4587_v21  ;;  %v5892_v51 = vpack.c.bf16 %v4596_v50, %v4595_v48  ;;  %v4615_v27 = vld [vmem:[%s7502_s4 + $0x280] sm:$0xff] }
 0x20d   : > { %v2602_v59 = vld [vmem:[#allocation2 + $0x4d] sm:$0xff]  ;;  %2591 = vst [vmem:[#allocation2 + $0x70] sm:$0xff] %v7067_v54  ;;  %5340 = vmatmul.mubr.f32.gmra.mrb[22].mxu0 %v2632_v58  ;;  %v2603_v61 = vld [vmem:[#allocation2 + $0x55] sm:$0xff]  ;;  %v4619_v36 = vld [vmem:[%s7502_s4 + $0x2a0] sm:$0xff] }
 0x20e   : > { %5393 = vmatmul.mubr.f32.gmra.mrb[8].mxu1 %v2602_v59  ;;  %5342 = vmatprep.mubr.f32.mxu0 %v2633_v60  ;;  %v2932_v44 = vld [vmem:[#allocation2 + $0x47] sm:$0xff]  ;;  %v2933_v47 = vld [vmem:[#allocation2 + $0x4f] sm:$0xff]  ;;  %v2934_v15 = vld [vmem:[#allocation2 + $0x57] sm:$0xff] }
 0x20f   : > { %5855 = vmatpush3.bf16.msra.mxu1 %v5852_v41  ;;  %5395 = vmatprep.mubr.f32.mxu1 %v2603_v61  ;;  %v2931_v41 = vld [vmem:[#allocation2 + $0x3f] sm:$0xff]  ;;  %v4600_v61 = vld [vmem:[%s7502_s4 + $0x208] sm:$0xff]  ;;  %v4613_v22 = vld [vmem:[%s7502_s4 + $0x270] sm:$0xff] }
 0x210   : > { %5857 = vmatprep.subr.bf16.mxu1 %v5856_v55  ;;  %v2634_v3 = vld [vmem:[#allocation2 + $0x5e] sm:$0xff]  ;;  %v2635_v5 = vld [vmem:[#allocation2 + $0x66] sm:$0xff]  ;;  %v3464_v48 = vld [vmem:[#allocation2 + $0x11] sm:$0xff] }
 0x211   : > { %v2604_v4 = vld [vmem:[#allocation2 + $0x5d] sm:$0xff]  ;;  %5343 = vmatmul.mubr.f32.gmra.mrb[24].mxu0 %v2634_v3  ;;  %v2605_v6 = vld [vmem:[#allocation2 + $0x65] sm:$0xff] }
 0x212   : > { %5396 = vmatmul.mubr.f32.gmra.mrb[10].mxu1 %v2604_v4  ;;  %5345 = vmatprep.mubr.f32.mxu0 %v2635_v5  ;;  %v2935_v52 = vld [vmem:[#allocation2 + $0x5f] sm:$0xff]  ;;  %v2936_v57 = vld [vmem:[#allocation2 + $0x67] sm:$0xff] }
 0x213   : > { %5859 = vmatpush3.bf16.msra.mxu1 %v5856_v55  ;;  %5398 = vmatprep.mubr.f32.mxu1 %v2605_v6  ;;  %v4597_v55 = vld [vmem:[%s7502_s4 + $0x1f0] sm:$0xff]  ;;  %v4599_v60 = vld [vmem:[%s7502_s4 + $0x200] sm:$0xff]  ;;  %v4602_v1 = vld [vmem:[%s7502_s4 + $0x218] sm:$0xff] }
 0x214   : > { %5861 = vmatprep.subr.bf16.mxu1 %v5860_v62  ;;  %v2636_v10 = vld [vmem:[#allocation2 + $0x6e] sm:$0xff]  ;;  %v5896_v58 = vpack.c.bf16 %v4598_v56, %v4597_v55  ;;  %v5904_v3 = vpack.c.bf16 %v4602_v1, %v4601_v0  ;;  %v4603_v4 = vld [vmem:[%s7502_s4 + $0x220] sm:$0xff]  ;;  %v4610_v16 = vld [vmem:[%s7502_s4 + $0x258] sm:$0xff] }
 0x215   : > { %v2606_v11 = vld [vmem:[#allocation2 + $0x6d] sm:$0xff]  ;;  %5346 = vmatmul.mubr.f32.gmra.mrb[26].mxu0 %v2636_v10  ;;  %v4607_v10 = vld [vmem:[%s7502_s4 + $0x240] sm:$0xff]  ;;  %v4626_v43 = vld [vmem:[%s7502_s4 + $0x2d8] sm:$0xff] }
 0x216   : > { %5399 = vmatmul.mubr.f32.gmra.mrb[12].mxu1 %v2606_v11  ;;  %v2937_v59 = vld [vmem:[#allocation2 + $0x6f] sm:$0xff]  ;;  %v4634_v50 = vld [vmem:[%s7502_s4 + $0x318] sm:$0xff]  ;;  %v7263_v55 = vld [vmem:[#allocation2 + $0x21] sm:$0xff] }
 0x217   : > { %5863 = vmatpush3.bf16.msra.mxu1 %v5860_v62  ;;  %5433 = vmatprep.mubr.f32.mxu1 %v2924_v8  ;;  %v5900_v62 = vpack.c.bf16 %v4600_v61, %v4599_v60  ;;  %v4604_v5 = vld [vmem:[%s7502_s4 + $0x228] sm:$0xff]  ;;  %v4606_v8 = vld [vmem:[%s7502_s4 + $0x238] sm:$0xff]  ;;  %v4639_v0 = vld [vmem:[%s7502_s4 + $0x340] sm:$0xff] }
 0x218   : > { %5865 = vmatprep.subr.bf16.mxu1 %v5864_v7  ;;  %v5908_v6 = vpack.c.bf16 %v4604_v5, %v4603_v4  ;;  %v4608_v11 = vld [vmem:[%s7502_s4 + $0x248] sm:$0xff]  ;;  %v3468_v60 = vld [vmem:[#allocation2 + $0x31] sm:$0xff] }
 0x219   : > { %v5916_v12 = vpack.c.bf16 %v4608_v11, %v4607_v10  ;;  %v4616_v28 = vld [vmem:[%s7502_s4 + $0x288] sm:$0xff]  ;;  %v3473_v10 = vld [vmem:[#allocation2 + $0x59] sm:$0xff] }
 0x21a   : > { %v4624_v42 = vld [vmem:[%s7502_s4 + $0x2c8] sm:$0xff]  ;;  %v4643_v11 = vld [vmem:[%s7502_s4 + $0x360] sm:$0xff] }
 0x21b   : > { %5867 = vmatpush3.bf16.msra.mxu1 %v5864_v7  ;;  %v4605_v7 = vld [vmem:[%s7502_s4 + $0x230] sm:$0xff]  ;;  %v4640_v1 = vld [vmem:[%s7502_s4 + $0x348] sm:$0xff] }
 0x21c   : > { %5869 = vmatprep.subr.bf16.mxu1 %v5868_v13  ;;  %v5912_v9 = vpack.c.bf16 %v4606_v8, %v4605_v7  ;;  %v5980_v4 = vpack.c.bf16 %v4640_v1, %v4639_v0  ;;  %v3471_v5 = vld [vmem:[#allocation2 + $0x49] sm:$0xff]  ;;  %v4642_v7 = vld [vmem:[%s7502_s4 + $0x358] sm:$0xff] }
 0x21d   : > { %v3472_v8 = vld [vmem:[#allocation2 + $0x51] sm:$0xff]  ;;  %v4672_v0 = vld [vmem:[%s7502_s4 + $0x448] sm:$0xff] }
 0x21e   : > { %5434 = vmatmul.mubr.f32.vlgmr.msra.gmra.mrb[0].mxu1 %v2925_v20  ;;  %v3830_v1 = vld [vmem:[#allocation2 + $0x4a] sm:$0xff] }
 0x21f   : > { %5436 = vmatprep.mubr.f32.mxu1 %v7101_v23  ;;  %5871 = vmatpush3.bf16.msra.mxu1 %v5868_v13  ;;  %v4609_v13 = vld [vmem:[%s7502_s4 + $0x250] sm:$0xff] }
 0x220   : > { %5873 = vmatprep.subr.bf16.mxu1 %v5872_v18  ;;  %v5920_v17 = vpack.c.bf16 %v4610_v16, %v4609_v13  ;;  %v3474_v13 = vld [vmem:[#allocation2 + $0x61] sm:$0xff] }
 0x222   : > { %5437 = vmatmul.mubr.f32.gmra.mrb[2].mxu1 %v2927_v25 }
 0x223   : > { %5439 = vmatprep.mubr.f32.mxu1 %v2928_v30  ;;  %5875 = vmatpush3.bf16.msra.mxu1 %v5872_v18  ;;  %v4611_v18 = vld [vmem:[%s7502_s4 + $0x260] sm:$0xff] }
 0x224   : > { %5877 = vmatprep.subr.bf16.mxu1 %v5876_v24 }
 0x226   : > { %5440 = vmatmul.mubr.f32.gmra.mrb[4].mxu1 %v2929_v32 }
 0x227   : > { %5442 = vmatprep.mubr.f32.mxu1 %v2930_v37  ;;  %5879 = vmatpush3.bf16.msra.mxu1 %v5876_v24 }
 0x228   : > { %5881 = vmatprep.subr.bf16.mxu1 %v5880_v31 }
 0x22a   : > { %5443 = vmatmul.mubr.f32.gmra.mrb[6].mxu1 %v2931_v41 }
 0x22b   : > { %5445 = vmatprep.mubr.f32.mxu1 %v2932_v44  ;;  %5883 = vmatpush3.bf16.msra.mxu1 %v5880_v31  ;;  %v4617_v31 = vld [vmem:[%s7502_s4 + $0x290] sm:$0xff] }
 0x22c   : > { %5885 = vmatprep.subr.bf16.mxu1 %v5884_v40 }
 0x22e   : > { %5446 = vmatmul.mubr.f32.gmra.mrb[8].mxu1 %v2933_v47 }
 0x22f   : > { %5448 = vmatprep.mubr.f32.mxu1 %v2934_v15  ;;  %5887 = vmatpush3.bf16.msra.mxu1 %v5884_v40  ;;  %v4621_v40 = vld [vmem:[%s7502_s4 + $0x2b0] sm:$0xff] }
 0x230   : > { %5889 = vmatprep.subr.bf16.mxu1 %v5888_v45 }
 0x232   : > { %5449 = vmatmul.mubr.f32.gmra.mrb[10].mxu1 %v2935_v52 }
 0x233   : > { %5451 = vmatprep.mubr.f32.mxu1 %v2936_v57  ;;  %5891 = vmatpush3.bf16.msra.mxu1 %v5888_v45  ;;  %v4630_v45 = vld [vmem:[%s7502_s4 + $0x2f8] sm:$0xff] }
 0x234   : > { %5893 = vmatprep.subr.bf16.mxu1 %v5892_v51 }
 0x236   : > { %5452 = vmatmul.mubr.f32.gmra.mrb[12].mxu1 %v2937_v59 }
 0x237   : > { %5895 = vmatpush3.bf16.msra.mxu1 %v5892_v51  ;;  %5486 = vmatprep.mubr.f32.mxu1 %v2925_v20  ;;  %v4612_v20 = vld [vmem:[%s7502_s4 + $0x268] sm:$0xff]  ;;  %v3465_v51 = vld [vmem:[#allocation2 + $0x19] sm:$0xff] }
 0x238   : > { %5897 = vmatprep.subr.bf16.mxu1 %v5896_v58  ;;  %v5924_v21 = vpack.c.bf16 %v4612_v20, %v4611_v18  ;;  %v4645_v18 = vld [vmem:[%s7502_s4 + $0x370] sm:$0xff]  ;;  %v4646_v20 = vld [vmem:[%s7502_s4 + $0x378] sm:$0xff] }
 0x23b   : > { %5899 = vmatpush3.bf16.msra.mxu1 %v5896_v58  ;;  %v4637_v58 = vld [vmem:[%s7502_s4 + $0x330] sm:$0xff] }
 0x23c   : > { %5901 = vmatprep.subr.bf16.mxu1 %v5900_v62 }
 0x23e   : > { %5487 = vmatmul.mubr.f32.vlgmr.msra.gmra.mrb[0].mxu1 %v7101_v23  ;;  %v4614_v23 = vld [vmem:[%s7502_s4 + $0x278] sm:$0xff] }
 0x23f   : > { %5489 = vmatprep.mubr.f32.mxu1 %v2927_v25  ;;  %5903 = vmatpush3.bf16.msra.mxu1 %v5900_v62  ;;  %v5928_v24 = vpack.c.bf16 %v4614_v23, %v4613_v22  ;;  %v3117_v25 = vld [vmem:[#allocation2 + $0x77] sm:$0xff]  ;;  %v5992_v22 = vpack.c.bf16 %v4646_v20, %v4645_v18 }
 0x240   : > { %5905 = vmatprep.subr.bf16.mxu1 %v5904_v3  ;;  %v3469_v62 = vld [vmem:[#allocation2 + $0x39] sm:$0xff]  ;;  %v4677_v18 = vld [vmem:[%s7502_s4 + $0x470] sm:$0xff] }
 0x241   : > { %v3477_v23 = vld [vmem:[#allocation2 + $0x79] sm:$0xff] }
 0x242   : > { %5490 = vmatmul.mubr.f32.gmra.mrb[2].mxu1 %v2928_v30  ;;  %v5932_v30 = vpack.c.bf16 %v4616_v28, %v4615_v27  ;;  %v4649_v28 = vld [vmem:[%s7502_s4 + $0x390] sm:$0xff]  ;;  %v4678_v20 = vld [vmem:[%s7502_s4 + $0x478] sm:$0xff] }
 0x243   : > { %5492 = vmatprep.mubr.f32.mxu1 %v2929_v32  ;;  %5907 = vmatpush3.bf16.msra.mxu1 %v5904_v3  ;;  %v4618_v32 = vld [vmem:[%s7502_s4 + $0x298] sm:$0xff]  ;;  %v3470_v3 = vld [vmem:[#allocation2 + $0x41] sm:$0xff] }
 0x244   : > { %5909 = vmatprep.subr.bf16.mxu1 %v5908_v6  ;;  %v5936_v33 = vpack.c.bf16 %v4618_v32, %v4617_v31  ;;  %v4651_v32 = vld [vmem:[%s7502_s4 + $0x3a0] sm:$0xff] }
 0x246   : > { %5493 = vmatmul.mubr.f32.gmra.mrb[4].mxu1 %v2930_v37 }
 0x247   : > { %5495 = vmatprep.mubr.f32.mxu1 %v2931_v41  ;;  %5911 = vmatpush3.bf16.msra.mxu1 %v5908_v6  ;;  %v4622_v41 = vld [vmem:[%s7502_s4 + $0x2b8] sm:$0xff]  ;;  %v4641_v6 = vld [vmem:[%s7502_s4 + $0x350] sm:$0xff] }
 0x248   : > { %5913 = vmatprep.subr.bf16.mxu1 %v5912_v9 }
 0x24a   : > { %5496 = vmatmul.mubr.f32.gmra.mrb[6].mxu1 %v2932_v44  ;;  %v4628_v44 = vld [vmem:[%s7502_s4 + $0x2e8] sm:$0xff] }
 0x24b   : > { %5498 = vmatprep.mubr.f32.mxu1 %v2933_v47  ;;  %5915 = vmatpush3.bf16.msra.mxu1 %v5912_v9  ;;  %v4632_v47 = vld [vmem:[%s7502_s4 + $0x308] sm:$0xff]  ;;  %v5984_v9 = vpack.c.bf16 %v4642_v7, %v4641_v6  ;;  %v4674_v6 = vld [vmem:[%s7502_s4 + $0x458] sm:$0xff] }
 0x24c   : > { %5917 = vmatprep.subr.bf16.mxu1 %v5916_v12  ;;  %v3832_v7 = vld [vmem:[#allocation2 + $0x5a] sm:$0xff] }
 0x24e   : > { %5499 = vmatmul.mubr.f32.gmra.mrb[8].mxu1 %v2934_v15 }
 0x24f   : > { %5501 = vmatprep.mubr.f32.mxu1 %v2935_v52  ;;  %5919 = vmatpush3.bf16.msra.mxu1 %v5916_v12  ;;  %v4636_v52 = vld [vmem:[%s7502_s4 + $0x328] sm:$0xff] }
 0x250   : > { %5921 = vmatprep.subr.bf16.mxu1 %v5920_v17  ;;  %v4644_v12 = vld [vmem:[%s7502_s4 + $0x368] sm:$0xff] }
 0x251   : > { %v5988_v16 = vpack.c.bf16 %v4644_v12, %v4643_v11  ;;  %v4676_v11 = vld [vmem:[%s7502_s4 + $0x468] sm:$0xff] }
 0x252   : > { %5502 = vmatmul.mubr.f32.gmra.mrb[10].mxu1 %v2936_v57  ;;  %v3467_v57 = vld [vmem:[#allocation2 + $0x29] sm:$0xff] }
 0x253   : > { %5504 = vmatprep.mubr.f32.mxu1 %v2937_v59  ;;  %5923 = vmatpush3.bf16.msra.mxu1 %v5920_v17  ;;  %v4638_v59 = vld [vmem:[%s7502_s4 + $0x338] sm:$0xff]  ;;  %v3475_v17 = vld [vmem:[#allocation2 + $0x69] sm:$0xff] }
 0x254   : > { %5925 = vmatprep.subr.bf16.mxu1 %v5924_v21  ;;  %v5976_v61 = vpack.c.bf16 %v4638_v59, %v4637_v58  ;;  %v4670_v58 = vld [vmem:[%s7502_s4 + $0x438] sm:$0xff]  ;;  %v3834_v12 = vld [vmem:[#allocation2 + $0x6a] sm:$0xff] }
 0x255   : > { %v3828_v59 = vld [vmem:[#allocation2 + $0x3a] sm:$0xff] }
 0x256   : > { %5505 = vmatmul.mubr.f32.gmra.mrb[12].mxu1 %v3117_v25  ;;  %v4648_v25 = vld [vmem:[%s7502_s4 + $0x388] sm:$0xff] }
 0x257   : > { %5927 = vmatpush3.bf16.msra.mxu1 %v5924_v21  ;;  %5539 = vmatprep.mubr.f32.mxu1 %v6989_v29  ;;  %v4620_v29 = vld [vmem:[%s7502_s4 + $0x2a8] sm:$0xff]  ;;  %v3476_v21 = vld [vmem:[#allocation2 + $0x71] sm:$0xff] }
 0x258   : > { %5929 = vmatprep.subr.bf16.mxu1 %v5928_v24  ;;  %v5940_v37 = vpack.c.bf16 %v4620_v29, %v4619_v36  ;;  %v4653_v29 = vld [vmem:[%s7502_s4 + $0x3b0] sm:$0xff] }
 0x25b   : > { %5931 = vmatpush3.bf16.msra.mxu1 %v5928_v24  ;;  %v4647_v24 = vld [vmem:[%s7502_s4 + $0x380] sm:$0xff] }
 0x25c   : > { %5933 = vmatprep.subr.bf16.mxu1 %v5932_v30  ;;  %v5996_v27 = vpack.c.bf16 %v4648_v25, %v4647_v24  ;;  %v6056_v24 = vpack.c.bf16 %v4678_v20, %v4677_v18 }
 0x25e   : > { %5540 = vmatmul.mubr.f32.vlgmr.msra.gmra.mrb[0].mxu1 %v6986_v26  ;;  %v5944_v26 = vpack.c.bf16 %v4622_v41, %v4621_v40  ;;  %v4655_v41 = vld [vmem:[%s7502_s4 + $0x3c0] sm:$0xff] }
 0x25f   : > { %5542 = vmatprep.mubr.f32.mxu1 %v6997_v38  ;;  %5935 = vmatpush3.bf16.msra.mxu1 %v5932_v30  ;;  %v4623_v38 = vld [vmem:[%s7502_s4 + $0x2c0] sm:$0xff]  ;;  %v4650_v30 = vld [vmem:[%s7502_s4 + $0x398] sm:$0xff] }
 0x260   : > { %5937 = vmatprep.subr.bf16.mxu1 %v5936_v33  ;;  %v6000_v31 = vpack.c.bf16 %v4650_v30, %v4649_v28  ;;  %v4004_v28 = vld [vmem:[#allocation2 + $0x1b] sm:$0xff] }
 0x262   : > { %5543 = vmatmul.mubr.f32.gmra.mrb[2].mxu1 %v6994_v34  ;;  %v5948_v34 = vpack.c.bf16 %v4624_v42, %v4623_v38  ;;  %v4657_v42 = vld [vmem:[%s7502_s4 + $0x3d0] sm:$0xff] }
 0x263   : > { %5545 = vmatprep.mubr.f32.mxu1 %v7011_v49  ;;  %5939 = vmatpush3.bf16.msra.mxu1 %v5936_v33  ;;  %v4625_v49 = vld [vmem:[%s7502_s4 + $0x2d0] sm:$0xff]  ;;  %v4652_v33 = vld [vmem:[%s7502_s4 + $0x3a8] sm:$0xff] }
 0x264   : > { %5941 = vmatprep.subr.bf16.mxu1 %v5940_v37  ;;  %v6004_v36 = vpack.c.bf16 %v4652_v33, %v4651_v32  ;;  %v4005_v33 = vld [vmem:[#allocation2 + $0x23] sm:$0xff] }
 0x266   : > { %5546 = vmatmul.mubr.f32.gmra.mrb[4].mxu1 %v7008_v46  ;;  %v5952_v46 = vpack.c.bf16 %v4626_v43, %v4625_v49  ;;  %v4659_v43 = vld [vmem:[%s7502_s4 + $0x3e0] sm:$0xff] }
 0x267   : > { %5548 = vmatprep.mubr.f32.mxu1 %v7026_v2  ;;  %5943 = vmatpush3.bf16.msra.mxu1 %v5940_v37  ;;  %v4627_v2 = vld [vmem:[%s7502_s4 + $0x2e0] sm:$0xff]  ;;  %v4654_v37 = vld [vmem:[%s7502_s4 + $0x3b8] sm:$0xff] }
 0x268   : > { %5945 = vmatprep.subr.bf16.mxu1 %v5944_v26  ;;  %v6008_v40 = vpack.c.bf16 %v4654_v37, %v4653_v29  ;;  %v4006_v29 = vld [vmem:[#allocation2 + $0x2b] sm:$0xff] }
 0x26a   : > { %5549 = vmatmul.mubr.f32.gmra.mrb[6].mxu1 %v7022_v63  ;;  %v5956_v63 = vpack.c.bf16 %v4628_v44, %v4627_v2  ;;  %v4661_v44 = vld [vmem:[%s7502_s4 + $0x3f0] sm:$0xff] }
 0x26b   : > { %5551 = vmatprep.mubr.f32.mxu1 %v7040_v19  ;;  %5947 = vmatpush3.bf16.msra.mxu1 %v5944_v26  ;;  %v4629_v19 = vld [vmem:[%s7502_s4 + $0x2f0] sm:$0xff]  ;;  %v4656_v26 = vld [vmem:[%s7502_s4 + $0x3c8] sm:$0xff] }
 0x26c   : > { %5949 = vmatprep.subr.bf16.mxu1 %v5948_v34  ;;  %v6012_v38 = vpack.c.bf16 %v4656_v26, %v4655_v41  ;;  %v4008_v26 = vld [vmem:[#allocation2 + $0x3b] sm:$0xff] }
 0x26e   : > { %5552 = vmatmul.mubr.f32.gmra.mrb[8].mxu1 %v7037_v14  ;;  %v5960_v14 = vpack.c.bf16 %v4630_v45, %v4629_v19  ;;  %v3657_v19 = vld [vmem:[#allocation2 + $0x81] sm:$0xff] }
 0x26f   : > { %5554 = vmatprep.mubr.f32.mxu1 %v7054_v39  ;;  %5951 = vmatpush3.bf16.msra.mxu1 %v5948_v34  ;;  %v4631_v39 = vld [vmem:[%s7502_s4 + $0x300] sm:$0xff]  ;;  %v4658_v34 = vld [vmem:[%s7502_s4 + $0x3d8] sm:$0xff] }
 0x270   : > { %5953 = vmatprep.subr.bf16.mxu1 %v5952_v46  ;;  %v6016_v49 = vpack.c.bf16 %v4658_v34, %v4657_v42  ;;  %v4009_v42 = vld [vmem:[#allocation2 + $0x43] sm:$0xff] }
 0x272   : > { %5555 = vmatmul.mubr.f32.gmra.mrb[10].mxu1 %v7051_v35  ;;  %v5964_v35 = vpack.c.bf16 %v4632_v47, %v4631_v39  ;;  %v4664_v39 = vld [vmem:[%s7502_s4 + $0x408] sm:$0xff]  ;;  %v3824_v47 = vld [vmem:[#allocation2 + $0x1a] sm:$0xff] }
 0x273   : > { %5557 = vmatprep.mubr.f32.mxu1 %v7067_v54  ;;  %5955 = vmatpush3.bf16.msra.mxu1 %v5952_v46  ;;  %v4633_v54 = vld [vmem:[%s7502_s4 + $0x310] sm:$0xff]  ;;  %v4660_v46 = vld [vmem:[%s7502_s4 + $0x3e8] sm:$0xff] }
 0x274   : > { %5957 = vmatprep.subr.bf16.mxu1 %v5956_v63  ;;  %v5968_v15 = vpack.c.bf16 %v4634_v50, %v4633_v54  ;;  %v6020_v2 = vpack.c.bf16 %v4660_v46, %v4659_v43  ;;  %v4666_v54 = vld [vmem:[%s7502_s4 + $0x418] sm:$0xff] }
 0x275   : > { %v4011_v46 = vld [vmem:[#allocation2 + $0x53] sm:$0xff] }
 0x276   : > { %5558 = vmatmul.mubr.f32.gmra.mrb[12].mxu1 %v7065_v53  ;;  %v4635_v53 = vld [vmem:[%s7502_s4 + $0x320] sm:$0xff] }
 0x277   : > { %5959 = vmatpush3.bf16.msra.mxu1 %v5956_v63  ;;  %5592 = vmatprep.mubr.f32.mxu1 %v3464_v48  ;;  %v5972_v56 = vpack.c.bf16 %v4636_v52, %v4635_v53  ;;  %v4662_v63 = vld [vmem:[%s7502_s4 + $0x3f8] sm:$0xff]  ;;  %v4668_v53 = vld [vmem:[%s7502_s4 + $0x428] sm:$0xff] }
 0x278   : > { %5961 = vmatprep.subr.bf16.mxu1 %v5960_v14  ;;  %v6024_v45 = vpack.c.bf16 %v4662_v63, %v4661_v44  ;;  %v3826_v52 = vld [vmem:[#allocation2 + $0x2a] sm:$0xff]  ;;  %v4012_v44 = vld [vmem:[#allocation2 + $0x5b] sm:$0xff] }
 0x279   : > { %v4013_v63 = vld [vmem:[#allocation2 + $0x63] sm:$0xff] }
 0x27b   : > { %5963 = vmatpush3.bf16.msra.mxu1 %v5960_v14  ;;  %v4663_v14 = vld [vmem:[%s7502_s4 + $0x400] sm:$0xff] }
 0x27c   : > { %5965 = vmatprep.subr.bf16.mxu1 %v5964_v35  ;;  %v6028_v48 = vpack.c.bf16 %v4664_v39, %v4663_v14  ;;  %v4016_v14 = vld [vmem:[#allocation2 + $0x7b] sm:$0xff]  ;;  %v4017_v39 = vld [vmem:[#allocation2 + $0x83] sm:$0xff] }
 0x27e   : > { %5593 = vmatmul.mubr.f32.vlgmr.msra.gmra.mrb[0].mxu1 %v3465_v51 }
 0x27f   : > { %5595 = vmatprep.mubr.f32.mxu1 %v7263_v55  ;;  %5967 = vmatpush3.bf16.msra.mxu1 %v5964_v35  ;;  %v4665_v35 = vld [vmem:[%s7502_s4 + $0x410] sm:$0xff] }
 0x280   : > { %5969 = vmatprep.subr.bf16.mxu1 %v5968_v15  ;;  %v6032_v50 = vpack.c.bf16 %v4666_v54, %v4665_v35 }
 0x282   : > { %5596 = vmatmul.mubr.f32.gmra.mrb[2].mxu1 %v3467_v57 }
 0x283   : > { %5598 = vmatprep.mubr.f32.mxu1 %v3468_v60  ;;  %5971 = vmatpush3.bf16.msra.mxu1 %v5968_v15  ;;  %v3825_v15 = vld [vmem:[#allocation2 + $0x22] sm:$0xff] }
 0x284   : > { %5973 = vmatprep.subr.bf16.mxu1 %v5972_v56 }
 0x286   : > { %5599 = vmatmul.mubr.f32.gmra.mrb[4].mxu1 %v3469_v62 }
 0x287   : > { %5601 = vmatprep.mubr.f32.mxu1 %v3470_v3  ;;  %5975 = vmatpush3.bf16.msra.mxu1 %v5972_v56  ;;  %v3827_v56 = vld [vmem:[#allocation2 + $0x32] sm:$0xff] }
 0x288   : > { %5977 = vmatprep.subr.bf16.mxu1 %v5976_v61 }
 0x28a   : > { %5602 = vmatmul.mubr.f32.gmra.mrb[6].mxu1 %v3471_v5 }
 0x28b   : > { %5604 = vmatprep.mubr.f32.mxu1 %v3472_v8  ;;  %5979 = vmatpush3.bf16.msra.mxu1 %v5976_v61  ;;  %v3829_v61 = vld [vmem:[#allocation2 + $0x42] sm:$0xff] }
 0x28c   : > { %5981 = vmatprep.subr.bf16.mxu1 %v5980_v4 }
 0x28e   : > { %5605 = vmatmul.mubr.f32.gmra.mrb[8].mxu1 %v3473_v10 }
 0x28f   : > { %5607 = vmatprep.mubr.f32.mxu1 %v3474_v13  ;;  %5983 = vmatpush3.bf16.msra.mxu1 %v5980_v4  ;;  %v3831_v4 = vld [vmem:[#allocation2 + $0x52] sm:$0xff] }
 0x290   : > { %5985 = vmatprep.subr.bf16.mxu1 %v5984_v9 }
 0x292   : > { %5608 = vmatmul.mubr.f32.gmra.mrb[10].mxu1 %v3475_v17 }
 0x293   : > { %5610 = vmatprep.mubr.f32.mxu1 %v3476_v21  ;;  %5987 = vmatpush3.bf16.msra.mxu1 %v5984_v9  ;;  %v3833_v9 = vld [vmem:[#allocation2 + $0x62] sm:$0xff] }
 0x294   : > { %5989 = vmatprep.subr.bf16.mxu1 %v5988_v16 }
 0x296   : > { %5611 = vmatmul.mubr.f32.gmra.mrb[12].mxu1 %v3477_v23 }
 0x297   : > { %5991 = vmatpush3.bf16.msra.mxu1 %v5988_v16  ;;  %5645 = vmatprep.mubr.f32.mxu1 %v3465_v51  ;;  %v4667_v51 = vld [vmem:[%s7502_s4 + $0x420] sm:$0xff] }
 0x298   : > { %5993 = vmatprep.subr.bf16.mxu1 %v5992_v22 }
 0x29b   : > { %5995 = vmatpush3.bf16.msra.mxu1 %v5992_v22  ;;  %v3836_v22 = vld [vmem:[#allocation2 + $0x7a] sm:$0xff] }
 0x29c   : > { %5997 = vmatprep.subr.bf16.mxu1 %v5996_v27 }
 0x29e   : > { %5646 = vmatmul.mubr.f32.vlgmr.msra.gmra.mrb[0].mxu1 %v7263_v55  ;;  %v6036_v55 = vpack.c.bf16 %v4668_v53, %v4667_v51  ;;  %v4205_v53 = vld [vmem:[%s7422_s21] sm:$0xff] }
 0x29f   : > { %5648 = vmatprep.mubr.f32.mxu1 %v3467_v57  ;;  %5999 = vmatpush3.bf16.msra.mxu1 %v5996_v27  ;;  %v4669_v57 = vld [vmem:[%s7502_s4 + $0x430] sm:$0xff] }
 0x2a0   : > { %6001 = vmatprep.subr.bf16.mxu1 %v6000_v31 }
 0x2a2   : > { %5649 = vmatmul.mubr.f32.gmra.mrb[2].mxu1 %v3468_v60  ;;  %v6040_v60 = vpack.c.bf16 %v4670_v58, %v4669_v57 }
 0x2a3   : > { %5651 = vmatprep.mubr.f32.mxu1 %v3469_v62  ;;  %6003 = vmatpush3.bf16.msra.mxu1 %v6000_v31  ;;  %v4671_v62 = vld [vmem:[%s7502_s4 + $0x440] sm:$0xff] }
 0x2a4   : > { %6005 = vmatprep.subr.bf16.mxu1 %v6004_v36 }
 0x2a6   : > { %5652 = vmatmul.mubr.f32.gmra.mrb[4].mxu1 %v3470_v3  ;;  %v6044_v3 = vpack.c.bf16 %v4672_v0, %v4671_v62 }
 0x2a7   : > { %5654 = vmatprep.mubr.f32.mxu1 %v3471_v5  ;;  %6007 = vmatpush3.bf16.msra.mxu1 %v6004_v36  ;;  %v4673_v5 = vld [vmem:[%s7502_s4 + $0x450] sm:$0xff] }
 0x2a8   : > { %6009 = vmatprep.subr.bf16.mxu1 %v6008_v40 }
 0x2aa   : > { %5655 = vmatmul.mubr.f32.gmra.mrb[6].mxu1 %v3472_v8  ;;  %v6048_v8 = vpack.c.bf16 %v4674_v6, %v4673_v5 }
 0x2ab   : > { %5657 = vmatprep.mubr.f32.mxu1 %v3473_v10  ;;  %6011 = vmatpush3.bf16.msra.mxu1 %v6008_v40  ;;  %v4675_v10 = vld [vmem:[%s7502_s4 + $0x460] sm:$0xff]  ;;  %v4007_v40 = vld [vmem:[#allocation2 + $0x33] sm:$0xff] }
 0x2ac   : > { %6013 = vmatprep.subr.bf16.mxu1 %v6012_v38 }
 0x2ae   : > { %5658 = vmatmul.mubr.f32.gmra.mrb[8].mxu1 %v3474_v13  ;;  %v6052_v13 = vpack.c.bf16 %v4676_v11, %v4675_v10  ;;  %v4210_v10 = vld [vmem:[%s7422_s21 + $0x28] sm:$0xff] }
 0x2af   : > { %5660 = vmatprep.mubr.f32.mxu1 %v3475_v17  ;;  %6015 = vmatpush3.bf16.msra.mxu1 %v6012_v38  ;;  %v3835_v17 = vld [vmem:[#allocation2 + $0x72] sm:$0xff] }
 0x2b0   : > { %6017 = vmatprep.subr.bf16.mxu1 %v6016_v49 }
 0x2b2   : > { %5661 = vmatmul.mubr.f32.gmra.mrb[10].mxu1 %v3476_v21 }
 0x2b3   : > { %5663 = vmatprep.mubr.f32.mxu1 %v3477_v23  ;;  %6019 = vmatpush3.bf16.msra.mxu1 %v6016_v49  ;;  %v3837_v23 = vld [vmem:[#allocation2 + $0x82] sm:$0xff]  ;;  %v4010_v49 = vld [vmem:[#allocation2 + $0x4b] sm:$0xff] }
 0x2b4   : > { %6021 = vmatprep.subr.bf16.mxu1 %v6020_v2 }
 0x2b6   : > { %5664 = vmatmul.mubr.f32.gmra.mrb[12].mxu1 %v3657_v19  ;;  %v4014_v19 = vld [vmem:[#allocation2 + $0x6b] sm:$0xff] }
 0x2b7   : > { %6023 = vmatpush3.bf16.msra.mxu1 %v6020_v2  ;;  %5698 = vmatprep.mubr.f32.mxu1 %v3824_v47 }
 0x2b8   : > { %6025 = vmatprep.subr.bf16.mxu1 %v6024_v45 }
 0x2bb   : > { %6027 = vmatpush3.bf16.msra.mxu1 %v6024_v45  ;;  %v4015_v45 = vld [vmem:[#allocation2 + $0x73] sm:$0xff] }
 0x2bc   : > { %6029 = vmatprep.subr.bf16.mxu1 %v6028_v48 }
 0x2be   : > { %5699 = vmatmul.mubr.f32.vlgmr.msra.gmra.mrb[0].mxu1 %v3825_v15 }
 0x2bf   : > { %5701 = vmatprep.mubr.f32.mxu1 %v3826_v52  ;;  %6031 = vmatpush3.bf16.msra.mxu1 %v6028_v48  ;;  %v7427_v48 = vld [vmem:[%s7503_s5] ss:$0 sm:$0xff] }
 0x2c0   : > { %6033 = vmatprep.subr.bf16.mxu1 %v6032_v50 }
 0x2c2   : > { %5702 = vmatmul.mubr.f32.gmra.mrb[2].mxu1 %v3827_v56 }
 0x2c3   : > { %5704 = vmatprep.mubr.f32.mxu1 %v3828_v59  ;;  %6035 = vmatpush3.bf16.msra.mxu1 %v6032_v50  ;;  %v4206_v50 = vld [vmem:[%s7422_s21 + $0x8] sm:$0xff] }
 0x2c4   : > { %6037 = vmatprep.subr.bf16.mxu1 %v6036_v55 }
 0x2c6   : > { %5705 = vmatmul.mubr.f32.gmra.mrb[4].mxu1 %v3829_v61 }
 0x2c7   : > { %5707 = vmatprep.mubr.f32.mxu1 %v3830_v1  ;;  %6039 = vmatpush3.bf16.msra.mxu1 %v6036_v55  ;;  %v4207_v1 = vld [vmem:[%s7422_s21 + $0x10] sm:$0xff] }
 0x2c8   : > { %6041 = vmatprep.subr.bf16.mxu1 %v6040_v60 }
 0x2ca   : > { %5708 = vmatmul.mubr.f32.gmra.mrb[6].mxu1 %v3831_v4 }
 0x2cb   : > { %5710 = vmatprep.mubr.f32.mxu1 %v3832_v7  ;;  %6043 = vmatpush3.bf16.msra.mxu1 %v6040_v60  ;;  %v4208_v60 = vld [vmem:[%s7422_s21 + $0x18] sm:$0xff] }
 0x2cc   : > { %6045 = vmatprep.subr.bf16.mxu1 %v6044_v3 }
 0x2ce   : > { %5711 = vmatmul.mubr.f32.gmra.mrb[8].mxu1 %v3833_v9 }
 0x2cf   : > { %5713 = vmatprep.mubr.f32.mxu1 %v3834_v12  ;;  %6047 = vmatpush3.bf16.msra.mxu1 %v6044_v3 }
 0x2d0   : > { %6049 = vmatprep.subr.bf16.mxu1 %v6048_v8  ;;  %v7387_v16 = vpop.f32.mrb[14].mxu0 }
 0x2d1   : > { %v2720_v21 = vpop.f32.mrb[15].mxu0 }
 0x2d2   : > { %5714 = vmatmul.mubr.f32.gmra.mrb[10].mxu1 %v3835_v17 }
 0x2d3   : > { %5716 = vmatprep.mubr.f32.mxu1 %v3836_v22  ;;  %6051 = vmatpush3.bf16.msra.mxu1 %v6048_v8 }
 0x2d4   : > { %6053 = vmatprep.subr.bf16.mxu1 %v6052_v13  ;;  %v5332_v25 = vpop.f32.mrb[16].mxu0 }
 0x2d5   : > { %v7395_v27 = vpop.f32.mrb[17].mxu0 }
 0x2d6   : > { %5717 = vmatmul.mubr.f32.gmra.mrb[12].mxu1 %v3837_v23 }
 0x2d7   : > { %6055 = vmatpush3.bf16.msra.mxu1 %v6052_v13  ;;  %5751 = vmatprep.mubr.f32.mxu1 %v4004_v28 }
 0x2d8   : > { %6057 = vmatprep.subr.bf16.mxu1 %v6056_v24  ;;  %v7397_v30 = vpop.f32.mrb[18].mxu0 }
 0x2d9   : > { %v7399_v31 = vpop.f32.mrb[19].mxu0 }
 0x2db   : > { %6059 = vmatpush3.bf16.msra.mxu1 %v6056_v24 }
 0x2dc   : > { %v7401_v32 = vpop.f32.mrb[20].mxu0 }
 0x2dd   : > { %v7403_v36 = vpop.f32.mrb[21].mxu0 }
 0x2de   : > { %5752 = vmatmul.mubr.f32.vlgmr.msra.gmra.mrb[0].mxu1 %v4005_v33 }
 0x2df   : > { %5754 = vmatprep.mubr.f32.mxu1 %v4006_v29 }
 0x2e0   : > { %v7405_v37 = vpop.f32.mrb[22].mxu0 }
 0x2e1   : > { %v7407_v41 = vpop.f32.mrb[23].mxu0 }
 0x2e2   : > { %5755 = vmatmul.mubr.f32.gmra.mrb[2].mxu1 %v4007_v40 }
 0x2e3   : > { %5757 = vmatprep.mubr.f32.mxu1 %v4008_v26 }
 0x2e4   : > { %v7409_v38 = vpop.f32.mrb[24].mxu0 }
 0x2e5   : > { %v7411_v34 = vpop.f32.mrb[25].mxu0 }
 0x2e6   : > { %5758 = vmatmul.mubr.f32.gmra.mrb[4].mxu1 %v4009_v42 }
 0x2e7   : > { %5760 = vmatprep.mubr.f32.mxu1 %v4010_v49 }
 0x2e8   : > { %v7413_v43 = vpop.f32.mrb[26].mxu0 }
 0x2e9   : > { %v7415_v2 = vpop.f32.mrb[27].mxu0 }
 0x2ea   : > { %5761 = vmatmul.mubr.f32.gmra.mrb[6].mxu1 %v4011_v46 }
 0x2eb   : > { %5763 = vmatprep.mubr.f32.mxu1 %v4012_v44 }
 0x2ee   : > { %5764 = vmatmul.mubr.f32.gmra.mrb[8].mxu1 %v4013_v63 }
 0x2ef   : > { %5766 = vmatprep.mubr.f32.mxu1 %v4014_v19  ;;  %v4213_v19 = vld [vmem:[%s7422_s21 + $0x40] sm:$0xff] }
 0x2f2   : > { %5767 = vmatmul.mubr.f32.gmra.mrb[10].mxu1 %v4015_v45 }
 0x2f3   : > { %5769 = vmatprep.mubr.f32.mxu1 %v4016_v14 }
 0x2f6   : > { %5770 = vmatmul.mubr.f32.gmra.mrb[12].mxu1 %v4017_v39 }
 0x3b1   : > { %v5753_v47 = vpop.f32.mrb[0].mxu1 }
 0x3b2   : > { %v6060_v35 = vadd.f32 %v5753_v47, %v7387_v16  ;;  %v4101_v54 = vpop.f32.mrb[1].mxu1  ;;  %v4209_v16 = vld [vmem:[%s7422_s21 + $0x20] sm:$0xff] }
 0x3b3   : > { %v6061_v15 = vadd.f32 %v4101_v54, %v2720_v21 }
 0x3b4   : > { %v4192_v51 = vadd.f32 %v6060_v35, %v7427_v48 }
 0x3b5   : > { %v4191_v52 = vadd.f32 %v6061_v15, %v7427_v48  ;;  %v5756_v55 = vpop.f32.mrb[2].mxu1 }
 0x3b6   : > { %v4220_v56 = vadd.f32 %v4206_v50, %v4192_v51  ;;  %v6062_v57 = vadd.f32 %v5756_v55, %v5332_v25  ;;  %v4111_v58 = vpop.f32.mrb[3].mxu1  ;;  %v4212_v25 = vld [vmem:[%s7422_s21 + $0x38] sm:$0xff] }
 0x3b7   : > { %v4219_v59 = vadd.f32 %v4205_v53, %v4191_v52  ;;  %v6063_v61 = vadd.f32 %v4111_v58, %v7395_v27  ;;  %v4215_v53 = vld [vmem:[%s7422_s21 + $0x50] sm:$0xff] }
 0x3b8   : > { %v4234_v62 = vmax.f32 %v4220_v56, 0.0  ;;  %v4194_v0 = vadd.f32 %v6062_v57, %v7427_v48 }
 0x3b9   : > { %v4233_v3 = vmax.f32 %v4219_v59, 0.0  ;;  %v4193_v4 = vadd.f32 %v6063_v61, %v7427_v48  ;;  %v5759_v5 = vpop.f32.mrb[4].mxu1  ;;  %v4218_v59 = vld [vmem:[%s7422_s21 + $0x68] sm:$0xff] }
 0x3ba   : > { %4248 = vst [vmem:[%s7437_s24 + $0x8] sm:$0xff] %v4234_v62  ;;  %v4222_v6 = vadd.f32 %v4208_v60, %v4194_v0  ;;  %v6064_v7 = vadd.f32 %v5759_v5, %v7397_v30  ;;  %v4121_v8 = vpop.f32.mrb[5].mxu1  ;;  %v4217_v0 = vld [vmem:[%s7422_s21 + $0x60] sm:$0xff] }
 0x3bb   : > { %4247 = vst [vmem:[%s7437_s24] sm:$0xff] %v4233_v3  ;;  %v4221_v9 = vadd.f32 %v4207_v1, %v4193_v4  ;;  %v6065_v11 = vadd.f32 %v4121_v8, %v7399_v31  ;;  %v4211_v31 = vld [vmem:[%s7422_s21 + $0x30] sm:$0xff] }
 0x3bc   : > { %v4236_v12 = vmax.f32 %v4222_v6, 0.0  ;;  %v4196_v13 = vadd.f32 %v6064_v7, %v7427_v48 }
 0x3bd   : > { %v4235_v17 = vmax.f32 %v4221_v9, 0.0  ;;  %v4195_v18 = vadd.f32 %v6065_v11, %v7427_v48  ;;  %v5762_v20 = vpop.f32.mrb[6].mxu1 }
 0x3be   : > { %4250 = vst [vmem:[%s7437_s24 + $0x18] sm:$0xff] %v4236_v12  ;;  %v4224_v21 = vadd.f32 %v4210_v10, %v4196_v13  ;;  %v6066_v22 = vadd.f32 %v5762_v20, %v7401_v32  ;;  %v4131_v23 = vpop.f32.mrb[7].mxu1 }
 0x3bf   : > { %4249 = vst [vmem:[%s7437_s24 + $0x10] sm:$0xff] %v4235_v17  ;;  %v4223_v24 = vadd.f32 %v4209_v16, %v4195_v18  ;;  %v6067_v27 = vadd.f32 %v4131_v23, %v7403_v36  ;;  %v4214_v36 = vld [vmem:[%s7422_s21 + $0x48] sm:$0xff] }
 0x3c0   : > { %v4238_v28 = vmax.f32 %v4224_v21, 0.0  ;;  %v4198_v30 = vadd.f32 %v6066_v22, %v7427_v48 }
 0x3c1   : > { %v4237_v33 = vmax.f32 %v4223_v24, 0.0  ;;  %v4197_v29 = vadd.f32 %v6067_v27, %v7427_v48  ;;  %v5765_v40 = vpop.f32.mrb[8].mxu1 }
 0x3c2   : > { %4252 = vst [vmem:[%s7437_s24 + $0x28] sm:$0xff] %v4238_v28  ;;  %v4226_v32 = vadd.f32 %v4212_v25, %v4198_v30  ;;  %v6068_v26 = vadd.f32 %v5765_v40, %v7405_v37  ;;  %v4141_v42 = vpop.f32.mrb[9].mxu1 }
 0x3c3   : > { %4251 = vst [vmem:[%s7437_s24 + $0x20] sm:$0xff] %v4237_v33  ;;  %v4225_v49 = vadd.f32 %v4211_v31, %v4197_v29  ;;  %v6069_v46 = vadd.f32 %v4141_v42, %v7407_v41  ;;  %v4216_v41 = vld [vmem:[%s7422_s21 + $0x58] sm:$0xff] }
 0x3c4   : > { %v4240_v44 = vmax.f32 %v4226_v32, 0.0  ;;  %v4200_v63 = vadd.f32 %v6068_v26, %v7427_v48 }
 0x3c5   : > { %v4239_v45 = vmax.f32 %v4225_v49, 0.0  ;;  %v4199_v14 = vadd.f32 %v6069_v46, %v7427_v48  ;;  %v5768_v39 = vpop.f32.mrb[10].mxu1 }
 0x3c6   : > { %4254 = vst [vmem:[%s7437_s24 + $0x38] sm:$0xff] %v4240_v44  ;;  %v4228_v37 = vadd.f32 %v4214_v36, %v4200_v63  ;;  %v6070_v47 = vadd.f32 %v5768_v39, %v7409_v38  ;;  %v4151_v35 = vpop.f32.mrb[11].mxu1 }
 0x3c7   : > { %4253 = vst [vmem:[%s7437_s24 + $0x30] sm:$0xff] %v4239_v45  ;;  %v4227_v54 = vadd.f32 %v4213_v19, %v4199_v14  ;;  %v6071_v50 = vadd.f32 %v4151_v35, %v7411_v34 }
 0x3c8   : > { %v4242_v15 = vmax.f32 %v4228_v37, 0.0  ;;  %v4202_v51 = vadd.f32 %v6070_v47, %v7427_v48 }
 0x3c9   : > { %v4241_v52 = vmax.f32 %v4227_v54, 0.0  ;;  %v4201_v55 = vadd.f32 %v6071_v50, %v7427_v48  ;;  %v5771_v56 = vpop.f32.mrb[12].mxu1 }
 0x3ca   : > { %4256 = vst [vmem:[%s7437_s24 + $0x48] sm:$0xff] %v4242_v15  ;;  %v4230_v38 = vadd.f32 %v4216_v41, %v4202_v51  ;;  %v6072_v57 = vadd.f32 %v5771_v56, %v7413_v43  ;;  %v4161_v58 = vpop.f32.mrb[13].mxu1 }
 0x3cb   : > { %4255 = vst [vmem:[%s7437_s24 + $0x40] sm:$0xff] %v4241_v52  ;;  %v4229_v34 = vadd.f32 %v4215_v53, %v4201_v55  ;;  %v6073_v60 = vadd.f32 %v4161_v58, %v7415_v2 }
 0x3cc   : > { %v4244_v61 = vmax.f32 %v4230_v38, 0.0  ;;  %v4204_v62 = vadd.f32 %v6072_v57, %v7427_v48 }
 0x3cd   : > { %v4243_v1 = vmax.f32 %v4229_v34, 0.0  ;;  %v4203_v3 = vadd.f32 %v6073_v60, %v7427_v48 }
 0x3ce   : > { %4258 = vst [vmem:[%s7437_s24 + $0x58] sm:$0xff] %v4244_v61  ;;  %v4232_v4 = vadd.f32 %v4218_v59, %v4204_v62 }
 0x3cf   : > { %4257 = vst [vmem:[%s7437_s24 + $0x50] sm:$0xff] %v4243_v1  ;;  %v4231_v5 = vadd.f32 %v4217_v0, %v4203_v3 }
 0x3d0   : > { %v4246_v43 = vmax.f32 %v4232_v4, 0.0 }
 0x3d1   : > { %v4245_v6 = vmax.f32 %v4231_v5, 0.0 }
 0x3d2   : > { %4260 = vst [vmem:[%s7437_s24 + $0x68] sm:$0xff] %v4246_v43 }
 0x3d3   : > { %4259 = vst [vmem:[%s7437_s24 + $0x60] sm:$0xff] %v4245_v6 }
 0x3d4 PF: > { %p14_p9 = scmp.ge.s32.totalorder %s6395_s28, 4   ;;  %s7506_s24 = smov %s6330_s25 }
 0x3d5   : > { %s7507_s25 = smov %s6404_s8  ;;  %s7508_s26 = smov %s6395_s28 }
 0x3d6   :  { %16 = sbr.rel (!%p14_p9) target bundleno = 2 (0x2), region = 143 }

</bundles_post_ra>
